<compile_context>
chip_gen: v5e
topology: v5e:2x2
jax: 0.10.0
libtpu: 0.0.40
codegen_flags: <defaults>
</compile_context>

<pallas_src>
import jax
import jax.numpy as jnp
from jax import lax
from jax.experimental import pallas as pl
from jax.experimental.pallas import tpu as pltpu


# ---------------------------------------------------------------------------
# Stand-in augmentation functions: aug_fn(t, x, dx) -> (rows, 1).
# Inside the kernel, `dx` arrives with n_aug exact-zero leading columns (the
# MXU lane-placement trick) and `x` is the full state tile, so augmentations
# must be invariant to that padding (norm-based ones are).
# TODO(synk): autodiff-based augmentations (exact / Hutchinson divergence of
#             d(dx)/dx) need in-kernel autodiff and are not implemented.
# TODO(synk): augmentations that are not padding-invariant, or that use t,
#             would need an in-kernel dx slice / an SMEM t scalar re-added.
# ---------------------------------------------------------------------------
def _l1_aug(t, x, dx):
    return jnp.sum(jnp.abs(dx), axis=-1, keepdims=True)


def _squared_l2_aug(t, x, dx):
    return jnp.sum(dx * dx, axis=-1, keepdims=True)


def _make_avf_kernel(aug_fns):
    """Fused vector-field + augmentation kernel; one batch tile per grid step."""
    n_aug = len(aug_fns)

    def kernel(x_ref, w1_ref, beff_ref, w2_ref, b2_ref, out_ref):
        x = x_ref[...]                                        # (tb, Win) f32
        # MXU matmuls with (optionally bf16) operands, f32 accumulation.
        h = jnp.tanh(
            jnp.dot(x.astype(w1_ref.dtype), w1_ref[...],
                    preferred_element_type=jnp.float32)
            + beff_ref[...])                                  # (tb, H) f32
        # W2 / b2 carry n_aug leading zero columns -> dx lands directly at
        # lane offset n_aug of the fused output tile ("cat" done by the MXU).
        dxw = (jnp.dot(h.astype(w2_ref.dtype), w2_ref[...],
                       preferred_element_type=jnp.float32)
               + b2_ref[...])                                 # (tb, Wout) f32
        out = dxw
        if n_aug:
            col = lax.broadcasted_iota(jnp.int32, dxw.shape, 1)
            for j, fn in enumerate(aug_fns):                  # fill lanes [0, n_aug)
                out = jnp.where(col == j, fn(None, x, dxw), out)
        out_ref[...] = out.astype(out_ref.dtype)              # one dense store

    return kernel


class AugmentedVectorFieldPallas:
    """JAX/Pallas port of AugmentedVectorField.forward (fused net + augs)."""

    def __init__(self, dim, hidden, aug_fns=(_l1_aug, _squared_l2_aug),
                 key=None, block_b=256, mxu_dtype=jnp.bfloat16,
                 single_buffer_weights=False):
        assert isinstance(dim, int), "only flat (int) dim supported here"
        assert block_b % 8 == 0, "batch tile must be a multiple of 8 sublanes"
        self.dim = int(dim)
        self.hidden = int(hidden)
        self.aug_fns = tuple(aug_fns)
        self.n_aug = len(self.aug_fns)
        self.block_b = int(block_b)
        self.mxu_dtype = mxu_dtype
        self.single_buffer_weights = bool(single_buffer_weights)

        if key is None:
            key = jax.random.PRNGKey(0)
        k1, k2, k3 = jax.random.split(key, 3)
        D, H, n_aug = self.dim, self.hidden, self.n_aug
        s_in = 1.0 / (D ** 0.5)
        s_h = 1.0 / (H ** 0.5)
        # Master (f32) parameters of the stand-in `net`.
        self.w1 = jax.random.normal(k1, (D, H), jnp.float32) * s_in
        self.b1 = jnp.zeros((1, H), jnp.float32)
        self.tw = jax.random.normal(k3, (1, H), jnp.float32) * s_h
        self.w2 = jax.random.normal(k2, (H, D), jnp.float32) * s_h
        self.b2 = jnp.zeros((1, D), jnp.float32)

        # Kernel-side operand copies, built ONCE at init (zero runtime cost):
        #  * W1 padded with n_aug zero rows  -> kernel eats the raw state tile.
        #  * W2/b2 padded with n_aug zero leading columns -> dx placed at lane
        #    offset n_aug by the matmul itself (no lane shifting, no concat).
        mdt = mxu_dtype
        self.w1_padded = jnp.concatenate(
            [jnp.zeros((n_aug, H), jnp.float32), self.w1], axis=0).astype(mdt)
        self.w1_plain = self.w1.astype(mdt)
        self.w2_padded = jnp.concatenate(
            [jnp.zeros((H, n_aug), jnp.float32), self.w2], axis=1).astype(mdt)
        self.w2_plain = self.w2.astype(mdt)
        self.b2_padded = jnp.concatenate(
            [jnp.zeros((1, n_aug), jnp.float32), self.b2], axis=1)

    def __call__(self, t, state, augmented_input=True):
        n_aug, D, H = self.n_aug, self.dim, self.hidden
        assert state.ndim == 2, "flat 2-D state expected for int dim"

        if augmented_input:
            x_in = state                 # no slice: zero W1 rows absorb aug channels
            w1 = self.w1_padded
        else:
            x_in = state.reshape(-1, D)
            w1 = self.w1_plain
        if n_aug:
            w2, b2, w_out = self.w2_padded, self.b2_padded, n_aug + D
        else:
            w2, b2, w_out = self.w2_plain, self.b2, D

        B, w_in = x_in.shape
        assert w1.shape[0] == w_in

        # Fold the time conditioning into one effective bias (tiny XLA op).
        t = jnp.asarray(t, jnp.float32)
        beff = self.b1 + t * self.tw                          # (1, H) f32

        # Batch tiling: large tiles for MXU / pipeline efficiency; zero-pad any
        # ragged batch to a tile multiple instead of one whole-batch tile.
        tb = self.block_b
        if B < tb:
            tb = max(8, ((B + 7) // 8) * 8)
        b_pad = pl.cdiv(B, tb) * tb
        if b_pad != B:
            x_in = jnp.pad(x_in, ((0, b_pad - B), (0, 0)))
        grid = (b_pad // tb,)

        itemsize = jnp.dtype(x_in.dtype).itemsize
        weight_bytes = ((w1.size + w2.size) * jnp.dtype(self.mxu_dtype).itemsize
                        + (beff.size + b2.size) * 4)
        io_bytes = (b_pad * w_in + b_pad * w_out) * itemsize
        cost = pl.CostEstimate(
            flops=2 * b_pad * H * (w_in + w_out),
            transcendentals=b_pad * H,
            bytes_accessed=io_bytes + weight_bytes)

        # Weights use constant index maps -> fetched once, VMEM-resident.
        # Optional single-buffering avoids pointlessly double-buffering them
        # (matters on v7x's 64 MiB VMEM when dim/hidden are large).
        wmode = (dict(pipeline_mode=pl.Buffered(1))
                 if self.single_buffer_weights else {})
        const0 = lambda i: (0, 0)
        in_specs = [
            pl.BlockSpec((tb, w_in), lambda i: (i, 0)),       # x: batch-tiled stream
            pl.BlockSpec((w_in, H), const0, **wmode),         # W1 (zero-row padded)
            pl.BlockSpec((1, H), const0, **wmode),            # b_eff = b1 + t*tw
            pl.BlockSpec((H, w_out), const0, **wmode),        # W2 (zero-col padded)
            pl.BlockSpec((1, w_out), const0, **wmode),        # b2 (zero-col padded)
        ]

        cp = dict(dimension_semantics=("parallel",))
        # TODO(synk): on v7x consider pltpu.CORE_PARALLEL if "parallel" does not
        #             shard the batch grid across both TensorCores.
        vmem_est = (2 * (tb * w_in + tb * w_out) * itemsize
                    + 2 * weight_bytes + (1 << 20))
        if vmem_est > (24 << 20):
            cp["vmem_limit_bytes"] = int(vmem_est)

        out = pl.pallas_call(
            _make_avf_kernel(self.aug_fns),
            out_shape=jax.ShapeDtypeStruct((b_pad, w_out), x_in.dtype),
            grid=grid,
            in_specs=in_specs,
            out_specs=pl.BlockSpec((tb, w_out), lambda i: (i, 0)),
            compiler_params=pltpu.CompilerParams(**cp),
            cost_estimate=cost,
        )(x_in, w1, beff, w2, b2)

        # `+ 0*state` of the original forward is identically zero (autograd
        # plumbing only) -> omitted.
        # TODO(synk): add a custom_vjp if gradients w.r.t. the augmentation
        #             channels of `state` must match the PyTorch module.
        return out[:B] if b_pad != B else out


# ---------------------------------------------------------------------------
# Pure-JAX references (correctness check); mxu_dtype selects matmul operand
# precision so the kernel can be validated both matched-precision and vs f32.
# ---------------------------------------------------------------------------
def _reference_forward(t, state, mod, augmented_input=True,
                       mxu_dtype=jnp.float32):
    n_aug = mod.n_aug
    x = state[:, n_aug:] if augmented_input else state
    x = x.reshape(-1, mod.dim)
    t = jnp.asarray(t, jnp.float32)

    if mxu_dtype == jnp.float32:
        dot = lambda a, b: jnp.dot(a, b, precision=lax.Precision.HIGHEST)
    else:
        dot = lambda a, b: jnp.dot(a.astype(mxu_dtype), b.astype(mxu_dtype),
                                   preferred_element_type=jnp.float32)

    h = jnp.tanh(dot(x, mod.w1) + mod.b1 + t * mod.tw)
    dx = dot(h, mod.w2) + mod.b2
    if n_aug == 0:
        return dx
    augs = jnp.concatenate([fn(t, x, dx) for fn in mod.aug_fns], axis=1)
    out = jnp.concatenate([augs, dx], axis=1)
    if augmented_input:
        out = out + 0.0 * state            # identically zero, kept for fidelity
    return out


if __name__ == "__main__":
    key = jax.random.PRNGKey(0)
    k_params, k_state = jax.random.split(key)

    dim, hidden = 128, 128          # state feature width / MLP hidden width
    B = 500                         # not a multiple of 256 -> pads to 512 (2 tiles)
    mod = AugmentedVectorFieldPallas(dim=dim, hidden=hidden, key=k_params,
                                     block_b=256, mxu_dtype=jnp.bfloat16)
    state = jax.random.normal(k_state, (B, mod.n_aug + dim), jnp.float32)
    t = 0.5

    fwd = jax.jit(lambda tt, ss: mod(tt, ss))
    out = fwd(t, state)
    jax.block_until_ready(out)
    assert out.shape == (B, mod.n_aug + dim), out.shape

    # Matched-precision reference (same bf16 MXU operands, f32 accumulation).
    ref_bf16 = _reference_forward(t, state, mod, mxu_dtype=jnp.bfloat16)
    err_bf16 = float(jnp.max(jnp.abs(out - ref_bf16)))
    assert jnp.allclose(out, ref_bf16, rtol=2e-3, atol=2e-3), err_bf16

    # Full-f32 reference sanity check (difference = bf16 MXU operand rounding).
    ref_f32 = _reference_forward(t, state, mod, mxu_dtype=jnp.float32)
    err_f32 = float(jnp.max(jnp.abs(out - ref_f32)))
    assert jnp.allclose(out, ref_f32, rtol=5e-2, atol=5e-2), err_f32

    print("KERNEL_OK")
</pallas_src>

<mosaic_0001>
module attributes {stable_mosaic.version = 11 : i64} {
  func.func @kernel(%arg0: i32, %arg1: memref<256x130xf32, #tpu.memory_space<vmem>>, %arg2: memref<130x128xbf16, #tpu.memory_space<vmem>>, %arg3: memref<1x128xf32, #tpu.memory_space<vmem>>, %arg4: memref<128x130xbf16, #tpu.memory_space<vmem>>, %arg5: memref<1x130xf32, #tpu.memory_space<vmem>>, %arg6: memref<256x130xf32, #tpu.memory_space<vmem>>) attributes {dimension_semantics = [#tpu.dimension_semantics<parallel>], iteration_bounds = array<i64: 2>, scalar_prefetch = 0 : i64, scratch_operands = 0 : i64, tpu.core_type = #tpu.core_type<tc>, window_params = [{transform_indices = @transform_0, window_bounds = array<i64: 256, 130>}, {pipeline_mode = #tpu.pipeline_mode<synchronous>, transform_indices = @transform_1, window_bounds = array<i64: 130, 128>}, {pipeline_mode = #tpu.pipeline_mode<synchronous>, transform_indices = @transform_2, window_bounds = array<i64: 1, 128>}, {pipeline_mode = #tpu.pipeline_mode<synchronous>, transform_indices = @transform_3, window_bounds = array<i64: 128, 130>}, {pipeline_mode = #tpu.pipeline_mode<synchronous>, transform_indices = @transform_4, window_bounds = array<i64: 1, 130>}, {transform_indices = @transform_5, window_bounds = array<i64: 256, 130>}]} {
    %c0 = arith.constant 0 : index
    %c0_0 = arith.constant 0 : index
    %0 = vector.load %arg1[%c0, %c0_0] : memref<256x130xf32, #tpu.memory_space<vmem>>, vector<256x130xf32>
    %1 = arith.truncf %0 : vector<256x130xf32> to vector<256x130xbf16>
    %c0_1 = arith.constant 0 : index
    %c0_2 = arith.constant 0 : index
    %2 = vector.load %arg2[%c0_1, %c0_2] : memref<130x128xbf16, #tpu.memory_space<vmem>>, vector<130x128xbf16>
    %cst = arith.constant dense<0.000000e+00> : vector<256x128xf32>
    %3 = tpu.matmul %1, %2, %cst {dimension_numbers = #tpu.dot_dimension_numbers<[1], [0], [0], [1], [0, 0, 1, 1], [], []>} : vector<256x130xbf16>, vector<130x128xbf16>, vector<256x128xf32> -> vector<256x128xf32>
    %c0_3 = arith.constant 0 : index
    %c0_4 = arith.constant 0 : index
    %4 = vector.load %arg3[%c0_3, %c0_4] : memref<1x128xf32, #tpu.memory_space<vmem>>, vector<1x128xf32>
    %5 = vector.broadcast %4 : vector<1x128xf32> to vector<256x128xf32>
    %6 = arith.addf %3, %5 : vector<256x128xf32>
    %7 = math.tanh %6 : vector<256x128xf32>
    %8 = arith.truncf %7 : vector<256x128xf32> to vector<256x128xbf16>
    %c0_5 = arith.constant 0 : index
    %c0_6 = arith.constant 0 : index
    %9 = vector.load %arg4[%c0_5, %c0_6] : memref<128x130xbf16, #tpu.memory_space<vmem>>, vector<128x130xbf16>
    %cst_7 = arith.constant dense<0.000000e+00> : vector<256x130xf32>
    %10 = tpu.matmul %8, %9, %cst_7 {dimension_numbers = #tpu.dot_dimension_numbers<[1], [0], [0], [1], [0, 0, 1, 1], [], []>} : vector<256x128xbf16>, vector<128x130xbf16>, vector<256x130xf32> -> vector<256x130xf32>
    %c0_8 = arith.constant 0 : index
    %c0_9 = arith.constant 0 : index
    %11 = vector.load %arg5[%c0_8, %c0_9] : memref<1x130xf32, #tpu.memory_space<vmem>>, vector<1x130xf32>
    %12 = vector.broadcast %11 : vector<1x130xf32> to vector<256x130xf32>
    %13 = arith.addf %10, %12 : vector<256x130xf32>
    %14 = tpu.iota {dimensions = array<i32: 1>} : vector<256x130xi32>
    %c0_i32 = arith.constant 0 : i32
    %15 = vector.broadcast %c0_i32 : i32 to vector<256x130xi32>
    %16 = arith.cmpi eq, %14, %15 : vector<256x130xi32>
    %17 = math.absf %13 : vector<256x130xf32>
    %cst_10 = arith.constant dense<0.000000e+00> : vector<256xf32>
    %18 = vector.multi_reduction <add>, %17, %cst_10 [1] : vector<256x130xf32> to vector<256xf32>
    %19 = vector.shape_cast %18 : vector<256xf32> to vector<256x1xf32>
    %20 = vector.shape_cast %19 : vector<256x1xf32> to vector<256x1xf32>
    %21 = vector.broadcast %20 : vector<256x1xf32> to vector<256x130xf32>
    %22 = arith.select %16, %21, %13 : vector<256x130xi1>, vector<256x130xf32>
    %c1_i32 = arith.constant 1 : i32
    %23 = vector.broadcast %c1_i32 : i32 to vector<256x130xi32>
    %24 = arith.cmpi eq, %14, %23 : vector<256x130xi32>
    %25 = arith.mulf %13, %13 : vector<256x130xf32>
    %cst_11 = arith.constant dense<0.000000e+00> : vector<256xf32>
    %26 = vector.multi_reduction <add>, %25, %cst_11 [1] : vector<256x130xf32> to vector<256xf32>
    %27 = vector.shape_cast %26 : vector<256xf32> to vector<256x1xf32>
    %28 = vector.shape_cast %27 : vector<256x1xf32> to vector<256x1xf32>
    %29 = vector.broadcast %28 : vector<256x1xf32> to vector<256x130xf32>
    %30 = arith.select %24, %29, %22 : vector<256x130xi1>, vector<256x130xf32>
    %c0_12 = arith.constant 0 : index
    %c0_13 = arith.constant 0 : index
    %31 = vector.load %arg6[%c0_12, %c0_13] : memref<256x130xf32, #tpu.memory_space<vmem>>, vector<256x130xf32>
    tpu.vector_store %arg6[%c0_12, %c0_13], %30 {strides = array<i32>} : memref<256x130xf32, #tpu.memory_space<vmem>>, vector<256x130xf32>,
    return
  }
  func.func @transform_0(%arg0: i32) -> (i32, i32) {
    %c0_i32 = arith.constant 0 : i32
    %c0_i32_0 = arith.constant 0 : i32
    return %arg0, %c0_i32 : i32, i32
  }
  func.func @transform_1(%arg0: i32) -> (i32, i32) {
    %c0_i32 = arith.constant 0 : i32
    %c0_i32_0 = arith.constant 0 : i32
    %c0_i32_1 = arith.constant 0 : i32
    return %c0_i32, %c0_i32_0 : i32, i32
  }
  func.func @transform_2(%arg0: i32) -> (i32, i32) {
    %c0_i32 = arith.constant 0 : i32
    %c0_i32_0 = arith.constant 0 : i32
    %c0_i32_1 = arith.constant 0 : i32
    return %c0_i32, %c0_i32_0 : i32, i32
  }
  func.func @transform_3(%arg0: i32) -> (i32, i32) {
    %c0_i32 = arith.constant 0 : i32
    %c0_i32_0 = arith.constant 0 : i32
    %c0_i32_1 = arith.constant 0 : i32
    return %c0_i32, %c0_i32_0 : i32, i32
  }
  func.func @transform_4(%arg0: i32) -> (i32, i32) {
    %c0_i32 = arith.constant 0 : i32
    %c0_i32_0 = arith.constant 0 : i32
    %c0_i32_1 = arith.constant 0 : i32
    return %c0_i32, %c0_i32_0 : i32, i32
  }
  func.func @transform_5(%arg0: i32) -> (i32, i32) {
    %c0_i32 = arith.constant 0 : i32
    %c0_i32_0 = arith.constant 0 : i32
    return %arg0, %c0_i32 : i32, i32
  }
}

</mosaic_0001>

<bundles_post_ra>
// kernel: _lambda_.1
= control target key start
LH: loop header
LB: loop body
LE: loop exit
PB: predicated region body
PF: predicated region fallthrough
CT: control target
= control target key end

     0   :  { %s1864_s18 = smov 0   ;;  %s2687_s0 = inlined_call_operand.vmem [shape: f32[512,130], index: 0, kind: input, shape index: {}]   ;;  %s2688_s1 = inlined_call_operand.vmem [shape: bf16[130,128], index: 1, kind: input, shape index: {}]   ;;  %s2689_s2 = inlined_call_operand.vmem [shape: f32[1,128], index: 2, kind: input, shape index: {}]   ;;  %s2690_s3 = inlined_call_operand.vmem [shape: bf16[128,130], index: 3, kind: input, shape index: {}]   ;;  %s2691_s4 = inlined_call_operand.vmem [shape: f32[1,130], index: 4, kind: input, shape index: {}]   ;;  %s2692_s5 = inlined_call_operand.vmem [shape: f32[512,130], index: 5, kind: output, shape index: {}]  }
   0x1 LB: > { %s1602_s19 = sadd.s32 4294967295, %s1832_s18   ;;  %p1606_p0 = scmp.ge.s32.totalorder %s1832_s18, 1  ;;  %s1832_s18 = sphi %s1864_s18, %s15_s18  }
   0x2   : > { %p189_p1 = scmp.lt.s32.totalorder %s1832_s18, 3 }
   0x4   : > { %p190_p2 = pnand %p1606_p0, %p189_p1 }
   0x5   : > { %s1607_s22 = sshll.u32 (!%p190_p2), %s1602_s19, 5 }
   0x6   : > { %193 = sbr.rel (%p190_p2) target bundleno = 703 (0x2bf), region = 40  ;;  %p220_p3 = scmp.lt.s32.totalorder (!%p190_p2), %s1607_s22, 63 }
   0xb   : > { %v1736_v0 = vld [vmem:[%s2688_s1 + $0x38] sm:$0xff]  ;;  %v1735_v1 = vld [vmem:[%s2688_s1 + $0x30] sm:$0xff]  ;;  %v346_v2 = vld [vmem:[%s2688_s1 + $0x40] sm:$0x1]  ;;  %s2694_s22 = smov (!%p220_p3, %s1607_s22), 63  ;;  %vm451_vm0 = vcmask 1040384  }
   0xc   : > { %455 = vmatpush.bf16.msra.mxu0 %v1736_v0  ;;  %v384_v3 = vunpack.c.l.b16 %v346_v2  ;;  %s1727_s27 = sshll.u32 %s2694_s22, 4  ;;  %v1734_v5 = vld [vmem:[%s2688_s1 + $0x28] sm:$0xff]  ;;  %vm402_vm1 = vcmask 15360   ;;  %v1733_v10 = vld [vmem:[%s2688_s1 + $0x20] sm:$0xff]  ;;  %v1732_v11 = vld [vmem:[%s2688_s1 + $0x18] sm:$0xff] }
   0xd   : > { %s1892_s7 = scalar_lea.vmem %s2687_s0, %s1727_s27  ;;  %v1731_v12 = vld [vmem:[%s2688_s1 + $0x10] sm:$0xff]  ;;  %v1730_v15 = vld [vmem:[%s2688_s1 + $0x8] sm:$0xff]  ;;  %v1729_v17 = vld [vmem:[%s2688_s1] sm:$0xff]  ;;  %s2122_s26 = scalar_lea.vmem %s2692_s5, %s1727_s27 }
   0xe   : > { %v393_v4 = vpack.c.b16 %v384_v3, %v384_v3  ;;  %v235_v7 = vld [vmem:[%s1892_s7 + $0x8] sm:$0xff]  ;;  %v237_v8 = vld [vmem:[%s1892_s7 + $0x18] sm:$0xff]  ;;  %v234_v18 = vld [vmem:[%s1892_s7] sm:$0xff] }
   0xf   : > { %v299_v9 = vpack.c.bf16 %v237_v8, %v235_v7  ;;  %v239_v13 = vld [vmem:[%s1892_s7 + $0x28] sm:$0xff]  ;;  %v241_v14 = vld [vmem:[%s1892_s7 + $0x38] sm:$0xff]  ;;  %v236_v19 = vld [vmem:[%s1892_s7 + $0x10] sm:$0xff] }
  0x10   : > { %456 = vmatpush.bf16.msra.mxu0 %v1735_v1  ;;  %v453_v6 = vsel %vm451_vm0, %v393_v4, 0  ;;  %v301_v16 = vpack.c.bf16 %v241_v14, %v239_v13  ;;  %v298_v20 = vpack.c.bf16 %v236_v19, %v234_v18  ;;  %v243_v21 = vld [vmem:[%s1892_s7 + $0x48] sm:$0xff]  ;;  %v245_v22 = vld [vmem:[%s1892_s7 + $0x58] sm:$0xff]  ;;  %v238_v24 = vld [vmem:[%s1892_s7 + $0x20] sm:$0xff] }
  0x11   : > { %551 = vmatpush.bf16.msra.mxu1 %v453_v6  ;;  %v303_v23 = vpack.c.bf16 %v245_v22, %v243_v21  ;;  %v240_v25 = vld [vmem:[%s1892_s7 + $0x30] sm:$0xff]  ;;  %v247_v27 = vld [vmem:[%s1892_s7 + $0x68] sm:$0xff]  ;;  %v249_v28 = vld [vmem:[%s1892_s7 + $0x78] sm:$0xff] }
  0x12   : > { %v300_v26 = vpack.c.bf16 %v240_v25, %v238_v24  ;;  %v305_v29 = vpack.c.bf16 %v249_v28, %v247_v27  ;;  %v242_v30 = vld [vmem:[%s1892_s7 + $0x40] sm:$0xff]  ;;  %v244_v31 = vld [vmem:[%s1892_s7 + $0x50] sm:$0xff]  ;;  %v251_v33 = vld [vmem:[%s1892_s7 + $0x88] sm:$0xff] }
  0x13   : > { %v302_v32 = vpack.c.bf16 %v244_v31, %v242_v30  ;;  %v253_v34 = vld [vmem:[%s1892_s7 + $0x98] sm:$0xff]  ;;  %v246_v36 = vld [vmem:[%s1892_s7 + $0x60] sm:$0xff]  ;;  %v248_v37 = vld [vmem:[%s1892_s7 + $0x70] sm:$0xff] }
  0x14   : > { %457 = vmatpush.bf16.msra.mxu0 %v1734_v5  ;;  %1645 = vmatmul.msk.bf16.vlgmr.msra.gmra.mxu1 %vm402_vm1, %v299_v9  ;;  %v307_v35 = vpack.c.bf16 %v253_v34, %v251_v33  ;;  %v304_v38 = vpack.c.bf16 %v248_v37, %v246_v36  ;;  %v255_v39 = vld [vmem:[%s1892_s7 + $0xa8] sm:$0xff]  ;;  %v257_v40 = vld [vmem:[%s1892_s7 + $0xb8] sm:$0xff]  ;;  %v250_v42 = vld [vmem:[%s1892_s7 + $0x80] sm:$0xff] }
  0x15   : > { %v309_v41 = vpack.c.bf16 %v257_v40, %v255_v39  ;;  %v252_v43 = vld [vmem:[%s1892_s7 + $0x90] sm:$0xff]  ;;  %v259_v45 = vld [vmem:[%s1892_s7 + $0xc8] sm:$0xff]  ;;  %v261_v46 = vld [vmem:[%s1892_s7 + $0xd8] sm:$0xff] }
  0x16   : > { %v306_v44 = vpack.c.bf16 %v252_v43, %v250_v42  ;;  %v311_v47 = vpack.c.bf16 %v261_v46, %v259_v45  ;;  %v254_v48 = vld [vmem:[%s1892_s7 + $0xa0] sm:$0xff]  ;;  %v256_v49 = vld [vmem:[%s1892_s7 + $0xb0] sm:$0xff]  ;;  %v1752_v52 = vld [vmem:[%s2690_s3 + $0x74] sm:$0xf0] }
  0x17   : > { %v308_v50 = vpack.c.bf16 %v256_v49, %v254_v48  ;;  %v1719_v51 = vld [vmem:[%s2690_s3 + $0x70] sm:$0xf]  ;;  %v1751_v53 = vld [vmem:[%s2690_s3 + $0x74] sm:$0xf]  ;;  %v1721_v55 = vld [vmem:[%s2690_s3 + $0x78] sm:$0xf0] }
  0x18   : > { %458 = vmatpush.bf16.msra.mxu0 %v1733_v10  ;;  %v1720_v54 = vor.u32 %v1752_v52, %v1719_v51  ;;  %v1711_v56 = vld [vmem:[%s2690_s3 + $0x60] sm:$0xf]  ;;  %v1750_v57 = vld [vmem:[%s2690_s3 + $0x64] sm:$0xf0]  ;;  %v1724_v58 = vor.u32 %v1751_v53, %v1721_v55  ;;  %v1749_v59 = vld [vmem:[%s2690_s3 + $0x64] sm:$0xf] }
  0x19   : > { %v1713_v60 = vld [vmem:[%s2690_s3 + $0x68] sm:$0xf0]  ;;  %v265_v62 = vld [vmem:[%s1892_s7 + $0xf8] sm:$0xff]  ;;  %v1712_v63 = vor.u32 %v1750_v57, %v1711_v56  ;;  %v1703_v1 = vld [vmem:[%s2690_s3 + $0x50] sm:$0xf] }
  0x1a   : > { %v263_v61 = vld [vmem:[%s1892_s7 + $0xe8] sm:$0xff]  ;;  %783 = vmatpush.bf16.msra.mxu2 %v1720_v54  ;;  %872 = vmatpush.bf16.msra.mxu3 %v1724_v58  ;;  %v1716_v0 = vor.u32 %v1749_v59, %v1713_v60  ;;  %v1748_v2 = vld [vmem:[%s2690_s3 + $0x54] sm:$0xf0]  ;;  %v1747_v3 = vld [vmem:[%s2690_s3 + $0x54] sm:$0xf] }
  0x1b   : > { %v1705_v4 = vld [vmem:[%s2690_s3 + $0x58] sm:$0xf0]  ;;  %v313_v5 = vpack.c.bf16 %v265_v62, %v263_v61  ;;  %v1704_v6 = vor.u32 %v1748_v2, %v1703_v1  ;;  %v258_v8 = vld [vmem:[%s1892_s7 + $0xc0] sm:$0xff]  ;;  %v260_v9 = vld [vmem:[%s1892_s7 + $0xd0] sm:$0xff] }
  0x1c   : > { %459 = vmatpush.bf16.msra.mxu0 %v1732_v11  ;;  %v1708_v7 = vor.u32 %v1747_v3, %v1705_v4  ;;  %v310_v10 = vpack.c.bf16 %v260_v9, %v258_v8  ;;  %v1695_v11 = vld [vmem:[%s2690_s3 + $0x40] sm:$0xf]  ;;  %v1745_v13 = vld [vmem:[%s2690_s3 + $0x44] sm:$0xf]  ;;  %v1697_v14 = vld [vmem:[%s2690_s3 + $0x48] sm:$0xf0] }
  0x1d   : > { %v1744_v18 = vld [vmem:[%s2690_s3 + $0x34] sm:$0xf0]  ;;  %v1743_v19 = vld [vmem:[%s2690_s3 + $0x34] sm:$0xf]  ;;  %v1689_v21 = vld [vmem:[%s2690_s3 + $0x38] sm:$0xf0] }
  0x1e   : > { %784 = vmatpush.bf16.msra.mxu2 %v1712_v63  ;;  %873 = vmatpush.bf16.msra.mxu3 %v1716_v0  ;;  %v267_v22 = vld [vmem:[%s1892_s7 + $0x108] sm:$0xff]  ;;  %v1692_v24 = vor.u32 %v1743_v19, %v1689_v21  ;;  %v1679_v25 = vld [vmem:[%s2690_s3 + $0x20] sm:$0xf]  ;;  %v1741_v27 = vld [vmem:[%s2690_s3 + $0x24] sm:$0xf] }
  0x1f   : > { %v1681_v30 = vld [vmem:[%s2690_s3 + $0x28] sm:$0xf0]  ;;  %v262_v33 = vld [vmem:[%s1892_s7 + $0xe0] sm:$0xff]  ;;  %v264_v34 = vld [vmem:[%s1892_s7 + $0xf0] sm:$0xff] }
  0x20   : > { %460 = vmatpush.bf16.msra.mxu0 %v1731_v12  ;;  %v1746_v12 = vld [vmem:[%s2690_s3 + $0x44] sm:$0xf0]  ;;  %v1740_v36 = vld [vmem:[%s2690_s3 + $0x14] sm:$0xf0]  ;;  %v1739_v37 = vld [vmem:[%s2690_s3 + $0x14] sm:$0xf] }
  0x21   : > { %v1673_v39 = vld [vmem:[%s2690_s3 + $0x18] sm:$0xf0]  ;;  %v1663_v42 = vld [vmem:[%s2690_s3] sm:$0xf]  ;;  %v1738_v43 = vld [vmem:[%s2690_s3 + $0x4] sm:$0xf0] }
  0x22   : > { %785 = vmatpush.bf16.msra.mxu2 %v1704_v6  ;;  %874 = vmatpush.bf16.msra.mxu3 %v1708_v7  ;;  %v1676_v40 = vor.u32 %v1739_v37, %v1673_v39  ;;  %v1665_v45 = vld [vmem:[%s2690_s3 + $0x8] sm:$0xf0]  ;;  %v266_v53 = vld [vmem:[%s1892_s7 + $0x100] sm:$0xff]  ;;  %v268_v54 = vld [vmem:[%s1892_s7 + $0x110] sm:$0xff] }
  0x23   : > { %v271_v49 = vld [vmem:[%s1892_s7 + $0x128] sm:$0xff]  ;;  %v314_v55 = vpack.c.bf16 %v268_v54, %v266_v53  ;;  %v2056_v56 = vld [vmem:[%s2689_s2] ss:$0 sm:$0xff]  ;;  %v277_v61 = vld [vmem:[%s1892_s7 + $0x158] sm:$0xff] }
  0x24   : > { %461 = vmatpush.bf16.msra.mxu0 %v1730_v15  ;;  %1646 = vmatmul.msk.bf16.gmra.mxu1 %vm402_vm1, %v301_v16  ;;  %v1696_v15 = vor.u32 %v1746_v12, %v1695_v11  ;;  %v1700_v16 = vor.u32 %v1745_v13, %v1697_v14  ;;  %v275_v60 = vld [vmem:[%s1892_s7 + $0x148] sm:$0xff]  ;;  %v270_v4 = vld [vmem:[%s1892_s7 + $0x120] sm:$0xff]  ;;  %v281_v14 = vld [vmem:[%s1892_s7 + $0x178] sm:$0xff] }
  0x25   : > { %v319_v1 = vpack.c.bf16 %v277_v61, %v275_v60  ;;  %v279_v13 = vld [vmem:[%s1892_s7 + $0x168] sm:$0xff]  ;;  %v274_v21 = vld [vmem:[%s1892_s7 + $0x140] sm:$0xff]  ;;  %v280_v39 = vld [vmem:[%s1892_s7 + $0x170] sm:$0xff] }
  0x26   : > { %786 = vmatpush.bf16.msra.mxu2 %v1696_v15  ;;  %875 = vmatpush.bf16.msra.mxu3 %v1700_v16 }
  0x28   : > { %462 = vmatpush.bf16.msra.mxu0 %v1729_v17  ;;  %v1687_v17 = vld [vmem:[%s2690_s3 + $0x30] sm:$0xf] }
  0x2a   : > { %876 = vmatpush.bf16.msra.mxu3 %v1692_v24 }
  0x2b   : > { %463 = vmatmul.bf16.vlgmr.msra.gmra.mxu0 %v298_v20  ;;  %v1688_v20 = vor.u32 %v1744_v18, %v1687_v17  ;;  %v321_v18 = vpack.c.bf16 %v281_v14, %v279_v13 }
  0x2d   : > { %787 = vmatpush.bf16.msra.mxu2 %v1688_v20 }
  0x34   : > { %1647 = vmatmul.msk.bf16.gmra.mxu1 %vm402_vm1, %v303_v23  ;;  %v269_v23 = vld [vmem:[%s1892_s7 + $0x118] sm:$0xff] }
  0x35   : > { %v315_v28 = vpack.c.bf16 %v269_v23, %v267_v22  ;;  %v276_v22 = vld [vmem:[%s1892_s7 + $0x150] sm:$0xff] }
  0x36   : > { %v318_v23 = vpack.c.bf16 %v276_v22, %v274_v21 }
  0x3b   : > { %468 = vmatmul.bf16.gmra.mxu0 %v300_v26  ;;  %v1742_v26 = vld [vmem:[%s2690_s3 + $0x24] sm:$0xf0] }
  0x44   : > { %1648 = vmatmul.msk.bf16.gmra.mxu1 %vm402_vm1, %v305_v29  ;;  %v1680_v29 = vor.u32 %v1742_v26, %v1679_v25 }
  0x46   : > { %788 = vmatpush.bf16.msra.mxu2 %v1680_v29 }
  0x4b   : > { %473 = vmatmul.bf16.gmra.mxu0 %v302_v32  ;;  %v1684_v32 = vor.u32 %v1741_v27, %v1681_v30  ;;  %v283_v30 = vld [vmem:[%s1892_s7 + $0x188] sm:$0xff] }
  0x4d   : > { %877 = vmatpush.bf16.msra.mxu3 %v1684_v32 }
  0x51   : > { %878 = vmatpush.bf16.msra.mxu3 %v1676_v40 }
  0x54   : > { %1649 = vmatmul.msk.bf16.gmra.mxu1 %vm402_vm1, %v307_v35  ;;  %v1671_v35 = vld [vmem:[%s2690_s3 + $0x10] sm:$0xf] }
  0x5b   : > { %478 = vmatmul.bf16.gmra.mxu0 %v304_v38  ;;  %v1672_v38 = vor.u32 %v1740_v36, %v1671_v35 }
  0x5d   : > { %789 = vmatpush.bf16.msra.mxu2 %v1672_v38  ;;  %v278_v38 = vld [vmem:[%s1892_s7 + $0x160] sm:$0xff] }
  0x5e   : > { %v320_v40 = vpack.c.bf16 %v280_v39, %v278_v38 }
  0x64   : > { %1650 = vmatmul.msk.bf16.gmra.mxu1 %vm402_vm1, %v309_v41  ;;  %v312_v41 = vpack.c.bf16 %v264_v34, %v262_v33 }
  0x6b   : > { %483 = vmatmul.bf16.gmra.mxu0 %v306_v44  ;;  %v1737_v44 = vld [vmem:[%s2690_s3 + $0x4] sm:$0xf] }
  0x6c   : > { %v1668_v48 = vor.u32 %v1737_v44, %v1665_v45 }
  0x6e   : > { %879 = vmatpush.bf16.msra.mxu3 %v1668_v48  ;;  %v289_v48 = vld [vmem:[%s1892_s7 + $0x1b8] sm:$0xff] }
  0x74   : > { %1651 = vmatmul.msk.bf16.gmra.mxu1 %vm402_vm1, %v311_v47  ;;  %v1664_v47 = vor.u32 %v1738_v43, %v1663_v42 }
  0x76   : > { %790 = vmatpush.bf16.msra.mxu2 %v1664_v47  ;;  %v287_v47 = vld [vmem:[%s1892_s7 + $0x1a8] sm:$0xff] }
  0x7b   : > { %488 = vmatmul.bf16.gmra.mxu0 %v308_v50  ;;  %v273_v50 = vld [vmem:[%s1892_s7 + $0x138] sm:$0xff] }
  0x7c   : > { %v317_v51 = vpack.c.bf16 %v273_v50, %v271_v49 }
  0x84   : > { %1652 = vmatmul.msk.bf16.gmra.mxu1 %vm402_vm1, %v313_v5  ;;  %v272_v5 = vld [vmem:[%s1892_s7 + $0x130] sm:$0xff] }
  0x85   : > { %v316_v6 = vpack.c.bf16 %v272_v5, %v270_v4 }
  0x8b   : > { %493 = vmatmul.bf16.gmra.mxu0 %v310_v10 }
  0x91   : > { %v553_v31 = vpop.f32.mrf.mxu1 }
  0x94   : > { %1653 = vmatmul.msk.bf16.gmra.mxu1 %vm402_vm1, %v315_v28 }
  0x99   : > { %v555_v46 = vpop.f32.mrf.mxu1 }
  0x9b   : > { %498 = vmatmul.bf16.gmra.mxu0 %v312_v41 }
  0xa1   : > { %v558_v52 = vpop.f32.mrf.mxu1 }
  0xa4   : > { %1654 = vmatmul.msk.bf16.gmra.mxu1 %vm402_vm1, %v317_v51 }
  0xa8   : > { %v464_v57 = vpop.f32.mrf.mxu0 }
  0xa9   : > { %v560_v58 = vpop.f32.mrf.mxu1  ;;  %v465_v59 = vadd.f32 %v2056_v56, %v464_v57  ;;  %v284_v57 = vld [vmem:[%s1892_s7 + $0x190] sm:$0xff] }
  0xab   : > { %503 = vmatmul.bf16.gmra.mxu0 %v314_v55  ;;  %v554_v62 = vadd.f32 %v553_v31, %v465_v59  ;;  %v285_v31 = vld [vmem:[%s1892_s7 + $0x198] sm:$0xff]  ;;  %v282_v55 = vld [vmem:[%s1892_s7 + $0x180] sm:$0xff] }
  0xac   : > { %v323_v35 = vpack.c.bf16 %v285_v31, %v283_v30 }
  0xad   : > { %1762 = vtanh.f32 %v554_v62 }
  0xb0   : > { %v466_v63 = vpop.f32.mrf.mxu0 }
  0xb1   : > { %v467_v0 = vadd.f32 %v2056_v56, %v466_v63  ;;  %v563_v2 = vpop.f32.mrf.mxu1 }
  0xb3   : > { %v556_v3 = vadd.f32 %v555_v46, %v467_v0  ;;  %v1763_v8 = vpop.eup %1762 }
  0xb4   : > { %1655 = vmatmul.msk.bf16.gmra.mxu1 %vm402_vm1, %v319_v1  ;;  %v291_v1 = vld [vmem:[%s1892_s7 + $0x1c8] sm:$0xff] }
  0xb5   : > { %1764 = vtanh.f32 %v556_v3 }
  0xb8   : > { %v469_v7 = vpop.f32.mrf.mxu0 }
  0xb9   : > { %v565_v9 = vpop.f32.mrf.mxu1  ;;  %v470_v11 = vadd.f32 %v2056_v56, %v469_v7 }
  0xbb   : > { %v1765_v10 = vpop.eup %1764  ;;  %508 = vmatmul.bf16.gmra.mxu0 %v316_v6  ;;  %v559_v15 = vadd.f32 %v558_v52, %v470_v11  ;;  %v325_v52 = vpack.c.bf16 %v289_v48, %v287_v47 }
  0xbc   : > { %v665_v12 = vpack.c.bf16 %v1765_v10, %v1763_v8  ;;  %v288_v10 = vld [vmem:[%s1892_s7 + $0x1b0] sm:$0xff] }
  0xbd   : > { %1766 = vtanh.f32 %v559_v15 }
  0xbe   : > { %791 = vmatmul.bf16.vlgmr.msra.gmra.mxu2 %v665_v12  ;;  %880 = vmatmul.bf16.vlgmr.msra.gmra.mxu3 %v665_v12 }
  0xc0   : > { %v471_v16 = vpop.f32.mrf.mxu0 }
  0xc1   : > { %v472_v17 = vadd.f32 %v2056_v56, %v471_v16  ;;  %v568_v19 = vpop.f32.mrf.mxu1 }
  0xc3   : > { %v561_v20 = vadd.f32 %v560_v58, %v472_v17  ;;  %v1767_v25 = vpop.eup %1766  ;;  %v322_v58 = vpack.c.bf16 %v284_v57, %v282_v55 }
  0xc4   : > { %1656 = vmatmul.msk.bf16.gmra.mxu1 %vm402_vm1, %v321_v18  ;;  %v295_v18 = vld [vmem:[%s1892_s7 + $0x1e8] sm:$0xff] }
  0xc5   : > { %1768 = vtanh.f32 %v561_v20 }
  0xc8   : > { %v474_v24 = vpop.f32.mrf.mxu0 }
  0xc9   : > { %v570_v26 = vpop.f32.mrf.mxu1  ;;  %v475_v28 = vadd.f32 %v2056_v56, %v474_v24 }
  0xcb   : > { %v1769_v27 = vpop.eup %1768  ;;  %513 = vmatmul.bf16.gmra.mxu0 %v318_v23  ;;  %v564_v32 = vadd.f32 %v563_v2, %v475_v28  ;;  %v293_v2 = vld [vmem:[%s1892_s7 + $0x1d8] sm:$0xff] }
  0xcc   : > { %v666_v29 = vpack.c.bf16 %v1769_v27, %v1767_v25  ;;  %v327_v6 = vpack.c.bf16 %v293_v2, %v291_v1  ;;  %v292_v27 = vld [vmem:[%s1892_s7 + $0x1d0] sm:$0xff] }
  0xcd   : > { %1770 = vtanh.f32 %v564_v32 }
  0xce   : > { %796 = vmatmul.bf16.gmra.mxu2 %v666_v29  ;;  %885 = vmatmul.bf16.gmra.mxu3 %v666_v29 }
  0xd0   : > { %v476_v33 = vpop.f32.mrf.mxu0 }
  0xd1   : > { %v477_v34 = vadd.f32 %v2056_v56, %v476_v33  ;;  %v573_v36 = vpop.f32.mrf.mxu1 }
  0xd3   : > { %v566_v37 = vadd.f32 %v565_v9, %v477_v34  ;;  %v1771_v42 = vpop.eup %1770  ;;  %v286_v9 = vld [vmem:[%s1892_s7 + $0x1a0] sm:$0xff] }
  0xd4   : > { %1657 = vmatmul.msk.bf16.gmra.mxu1 %vm402_vm1, %v323_v35  ;;  %v324_v11 = vpack.c.bf16 %v288_v10, %v286_v9 }
  0xd5   : > { %1772 = vtanh.f32 %v566_v37 }
  0xd8   : > { %v479_v41 = vpop.f32.mrf.mxu0 }
  0xd9   : > { %v575_v43 = vpop.f32.mrf.mxu1  ;;  %v480_v45 = vadd.f32 %v2056_v56, %v479_v41  ;;  %v296_v41 = vld [vmem:[%s1892_s7 + $0x1f0] sm:$0xff] }
  0xdb   : > { %v1773_v44 = vpop.eup %1772  ;;  %518 = vmatmul.bf16.gmra.mxu0 %v320_v40  ;;  %v569_v49 = vadd.f32 %v568_v19, %v480_v45  ;;  %v297_v19 = vld [vmem:[%s1892_s7 + $0x1f8] sm:$0xff]  ;;  %v294_v40 = vld [vmem:[%s1892_s7 + $0x1e0] sm:$0xff] }
  0xdc   : > { %v667_v46 = vpack.c.bf16 %v1773_v44, %v1771_v42  ;;  %v329_v23 = vpack.c.bf16 %v297_v19, %v295_v18  ;;  %v328_v42 = vpack.c.bf16 %v296_v41, %v294_v40 }
  0xdd   : > { %1774 = vtanh.f32 %v569_v49 }
  0xde   : > { %801 = vmatmul.bf16.gmra.mxu2 %v667_v46  ;;  %890 = vmatmul.bf16.gmra.mxu3 %v667_v46 }
  0xe0   : > { %v481_v50 = vpop.f32.mrf.mxu0 }
  0xe1   : > { %v482_v51 = vadd.f32 %v2056_v56, %v481_v50  ;;  %v578_v53 = vpop.f32.mrf.mxu1 }
  0xe3   : > { %v571_v54 = vadd.f32 %v570_v26, %v482_v51  ;;  %v1775_v60 = vpop.eup %1774  ;;  %v290_v26 = vld [vmem:[%s1892_s7 + $0x1c0] sm:$0xff] }
  0xe4   : > { %1658 = vmatmul.msk.bf16.gmra.mxu1 %vm402_vm1, %v325_v52  ;;  %v326_v28 = vpack.c.bf16 %v292_v27, %v290_v26 }
  0xe5   : > { %1776 = vtanh.f32 %v571_v54 }
  0xe8   : > { %v484_v59 = vpop.f32.mrf.mxu0 }
  0xe9   : > { %v580_v61 = vpop.f32.mrf.mxu1  ;;  %v485_v63 = vadd.f32 %v2056_v56, %v484_v59 }
  0xeb   : > { %v1777_v62 = vpop.eup %1776  ;;  %523 = vmatmul.bf16.gmra.mxu0 %v322_v58  ;;  %v574_v3 = vadd.f32 %v573_v36, %v485_v63 }
  0xec   : > { %v668_v0 = vpack.c.bf16 %v1777_v62, %v1775_v60 }
  0xed   : > { %1778 = vtanh.f32 %v574_v3 }
  0xee   : > { %806 = vmatmul.bf16.gmra.mxu2 %v668_v0  ;;  %895 = vmatmul.bf16.gmra.mxu3 %v668_v0 }
  0xf0   : > { %v486_v4 = vpop.f32.mrf.mxu0 }
  0xf1   : > { %v487_v5 = vadd.f32 %v2056_v56, %v486_v4  ;;  %v583_v7 = vpop.f32.mrf.mxu1 }
  0xf3   : > { %v576_v8 = vadd.f32 %v575_v43, %v487_v5  ;;  %v1779_v13 = vpop.eup %1778 }
  0xf4   : > { %1659 = vmatmul.msk.bf16.gmra.mxu1 %vm402_vm1, %v327_v6  ;;  %v697_v6 = vld [vmem:[%s2691_s4] sm:$0x3] }
  0xf5   : > { %1780 = vtanh.f32 %v576_v8  ;;  %v2112_v8 = vperm.slane %v697_v6, 0  ;;  %v2114_v9 = vperm.slane %v697_v6, 1 }
  0xf8   : > { %v489_v12 = vpop.f32.mrf.mxu0 }
  0xf9   : > { %v585_v14 = vpop.f32.mrf.mxu1  ;;  %v490_v16 = vadd.f32 %v2056_v56, %v489_v12 }
  0xfb   : > { %v1781_v15 = vpop.eup %1780  ;;  %528 = vmatmul.bf16.gmra.mxu0 %v324_v11  ;;  %v579_v20 = vadd.f32 %v578_v53, %v490_v16 }
  0xfc   : > { %v669_v17 = vpack.c.bf16 %v1781_v15, %v1779_v13 }
  0xfd   : > { %1782 = vtanh.f32 %v579_v20 }
  0xfe   : > { %811 = vmatmul.bf16.gmra.mxu2 %v669_v17  ;;  %900 = vmatmul.bf16.gmra.mxu3 %v669_v17 }
 0x100   : > { %v491_v21 = vpop.f32.mrf.mxu0 }
 0x101   : > { %v492_v22 = vadd.f32 %v2056_v56, %v491_v21  ;;  %v588_v24 = vpop.f32.mrf.mxu1 }
 0x103   : > { %v581_v25 = vadd.f32 %v580_v61, %v492_v22  ;;  %v1783_v30 = vpop.eup %1782 }
 0x104   : > { %1660 = vmatmul.msk.bf16.gmra.mxu1 %vm402_vm1, %v329_v23 }
 0x105   : > { %1784 = vtanh.f32 %v581_v25 }
 0x108   : > { %v494_v29 = vpop.f32.mrf.mxu0 }
 0x109   : > { %v590_v31 = vpop.f32.mrf.mxu1  ;;  %v495_v33 = vadd.f32 %v2056_v56, %v494_v29 }
 0x10b   : > { %v1785_v32 = vpop.eup %1784  ;;  %533 = vmatmul.bf16.gmra.mxu0 %v326_v28  ;;  %v584_v35 = vadd.f32 %v583_v7, %v495_v33 }
 0x10c   : > { %v670_v34 = vpack.c.bf16 %v1785_v32, %v1783_v30 }
 0x10d   : > { %1786 = vtanh.f32 %v584_v35 }
 0x10e   : > { %816 = vmatmul.bf16.gmra.mxu2 %v670_v34  ;;  %905 = vmatmul.bf16.gmra.mxu3 %v670_v34 }
 0x110   : > { %v496_v36 = vpop.f32.mrf.mxu0 }
 0x111   : > { %v497_v37 = vadd.f32 %v2056_v56, %v496_v36  ;;  %v593_v38 = vpop.f32.mrf.mxu1 }
 0x113   : > { %v586_v39 = vadd.f32 %v585_v14, %v497_v37  ;;  %v1787_v44 = vpop.eup %1786 }
 0x115   : > { %1788 = vtanh.f32 %v586_v39 }
 0x118   : > { %v499_v43 = vpop.f32.mrf.mxu0 }
 0x119   : > { %v595_v45 = vpop.f32.mrf.mxu1  ;;  %v500_v47 = vadd.f32 %v2056_v56, %v499_v43 }
 0x11b   : > { %v1789_v46 = vpop.eup %1788  ;;  %538 = vmatmul.bf16.gmra.mxu0 %v328_v42  ;;  %v589_v49 = vadd.f32 %v588_v24, %v500_v47 }
 0x11c   : > { %v671_v48 = vpack.c.bf16 %v1789_v46, %v1787_v44 }
 0x11d   : > { %1790 = vtanh.f32 %v589_v49 }
 0x11e   : > { %821 = vmatmul.bf16.gmra.mxu2 %v671_v48  ;;  %910 = vmatmul.bf16.gmra.mxu3 %v671_v48 }
 0x120   : > { %v501_v50 = vpop.f32.mrf.mxu0 }
 0x121   : > { %v502_v51 = vadd.f32 %v2056_v56, %v501_v50  ;;  %v598_v52 = vpop.f32.mrf.mxu1 }
 0x123   : > { %v591_v53 = vadd.f32 %v590_v31, %v502_v51  ;;  %v1791_v55 = vpop.eup %1790 }
 0x125   : > { %1792 = vtanh.f32 %v591_v53 }
 0x128   : > { %v504_v54 = vpop.f32.mrf.mxu0 }
 0x129   : > { %v600_v57 = vpop.f32.mrf.mxu1  ;;  %v505_v59 = vadd.f32 %v2056_v56, %v504_v54 }
 0x12b   : > { %v1793_v58 = vpop.eup %1792  ;;  %v594_v61 = vadd.f32 %v593_v38, %v505_v59 }
 0x12c   : > { %v672_v60 = vpack.c.bf16 %v1793_v58, %v1791_v55 }
 0x12d   : > { %1794 = vtanh.f32 %v594_v61 }
 0x12e   : > { %826 = vmatmul.bf16.gmra.mxu2 %v672_v60  ;;  %915 = vmatmul.bf16.gmra.mxu3 %v672_v60 }
 0x130   : > { %v506_v62 = vpop.f32.mrf.mxu0 }
 0x131   : > { %v507_v63 = vadd.f32 %v2056_v56, %v506_v62  ;;  %v603_v1 = vpop.f32.mrf.mxu1 }
 0x133   : > { %v596_v0 = vadd.f32 %v595_v45, %v507_v63  ;;  %v1795_v3 = vpop.eup %1794 }
 0x135   : > { %1796 = vtanh.f32 %v596_v0 }
 0x138   : > { %v509_v2 = vpop.f32.mrf.mxu0 }
 0x139   : > { %v510_v5 = vadd.f32 %v2056_v56, %v509_v2  ;;  %v605_v10 = vpop.f32.mrf.mxu1 }
 0x13b   : > { %v1797_v4 = vpop.eup %1796  ;;  %v599_v11 = vadd.f32 %v598_v52, %v510_v5 }
 0x13c   : > { %v673_v7 = vpack.c.bf16 %v1797_v4, %v1795_v3 }
 0x13d   : > { %1798 = vtanh.f32 %v599_v11 }
 0x13e   : > { %831 = vmatmul.bf16.gmra.mxu2 %v673_v7  ;;  %920 = vmatmul.bf16.gmra.mxu3 %v673_v7 }
 0x140   : > { %v511_v12 = vpop.f32.mrf.mxu0 }
 0x141   : > { %v512_v13 = vadd.f32 %v2056_v56, %v511_v12  ;;  %v792_v14 = vpop.f32.mrf.mxu2  ;;  %v881_v15 = vpop.f32.mrf.mxu3 }
 0x142   : > { %v2125_v16 = vadd.f32 %v792_v14, %v2112_v8  ;;  %v882_v17 = vadd.f32 %v881_v15, %v2114_v9  ;;  %v608_v28 = vpop.f32.mrf.mxu1 }
 0x143   : > { %v601_v18 = vadd.f32 %v600_v57, %v512_v13  ;;  %v1799_v29 = vpop.eup %1798 }
 0x144   : > { %1481 = vst.msk [vmem:[%s2122_s26 + $0x8] sm:$0xff] %vm402_vm1, %v882_v17  ;;  %v1224_v19 = vmul.f32 %v2125_v16, %v2125_v16  ;;  %v1225_v20 = vmul.f32 %v882_v17, %v882_v17  ;;  %v966_v21 = vand.u32 2147483647, %v2125_v16  ;;  %v967_v22 = vand.u32 2147483647, %v882_v17 }
 0x145   : > { %1800 = vtanh.f32 %v601_v18 }
 0x146   : > { %v1288_v23 = vsel %vm402_vm1, %v1225_v20, 0.0  ;;  %v1030_v24 = vsel %vm402_vm1, %v967_v22, 0.0 }
 0x147   : > { %v1289_v25 = vadd.f32 %v1288_v23, %v1224_v19  ;;  %v1031_v26 = vadd.f32 %v1030_v24, %v966_v21 }
 0x148   : > { %v514_v27 = vpop.f32.mrf.mxu0 }
 0x149   : > { %v794_v30 = vpop.f32.mrf.mxu2  ;;  %v883_v31 = vpop.f32.mrf.mxu3  ;;  %1290 = vadd.xlane.f32.xlu2 %v1289_v25  ;;  %1032 = vadd.xlane.f32.xlu0 %v1031_v26  ;;  %v515_v35 = vadd.f32 %v2056_v56, %v514_v27 }
 0x14a   : > { %v2136_v32 = vadd.f32 %v794_v30, %v2112_v8  ;;  %v884_v33 = vadd.f32 %v883_v31, %v2114_v9  ;;  %v610_v49 = vpop.f32.mrf.mxu1 }
 0x14b   : > { %v1801_v34 = vpop.eup %1800  ;;  %v604_v41 = vadd.f32 %v603_v1, %v515_v35 }
 0x14c   : > { %1483 = vst.msk [vmem:[%s2122_s26 + $0x18] sm:$0xff] %vm402_vm1, %v884_v33  ;;  %v674_v36 = vpack.c.bf16 %v1801_v34, %v1799_v29  ;;  %v968_v37 = vand.u32 2147483647, %v2136_v32  ;;  %v969_v38 = vand.u32 2147483647, %v884_v33  ;;  %v1227_v43 = vmul.f32 %v884_v33, %v884_v33 }
 0x14d   : > { %v1226_v51 = vmul.f32 %v2136_v32, %v2136_v32  ;;  %1802 = vtanh.f32 %v604_v41 }
 0x14e   : > { %836 = vmatmul.bf16.gmra.mxu2 %v674_v36  ;;  %925 = vmatmul.bf16.gmra.mxu3 %v674_v36  ;;  %v1034_v39 = vsel %vm402_vm1, %v969_v38, 0.0  ;;  %v1292_v54 = vsel %vm402_vm1, %v1227_v43, 0.0 }
 0x14f   : > { %v1035_v40 = vadd.f32 %v1034_v39, %v968_v37  ;;  %v1293_v58 = vadd.f32 %v1292_v54, %v1226_v51 }
 0x150   : > { %v516_v42 = vpop.f32.mrf.mxu0 }
 0x151   : > { %v517_v44 = vadd.f32 %v2056_v56, %v516_v42  ;;  %v797_v45 = vpop.f32.mrf.mxu2  ;;  %v886_v46 = vpop.f32.mrf.mxu3  ;;  %1036 = vadd.xlane.f32.xlu0 %v1035_v40 }
 0x152   : > { %v2146_v47 = vadd.f32 %v797_v45, %v2112_v8  ;;  %v887_v48 = vadd.f32 %v886_v46, %v2114_v9  ;;  %v613_v11 = vpop.f32.mrf.mxu1 }
 0x153   : > { %v606_v50 = vadd.f32 %v605_v10, %v517_v44  ;;  %v1803_v63 = vpop.eup %1802 }
 0x154   : > { %1485 = vst.msk [vmem:[%s2122_s26 + $0x28] sm:$0xff] %vm402_vm1, %v887_v48  ;;  %v970_v52 = vand.u32 2147483647, %v2146_v47  ;;  %v971_v53 = vand.u32 2147483647, %v887_v48  ;;  %v1229_v60 = vmul.f32 %v887_v48, %v887_v48  ;;  %v1228_v4 = vmul.f32 %v2146_v47, %v2146_v47 }
 0x155   : > { %1804 = vtanh.f32 %v606_v50 }
 0x156   : > { %v1038_v55 = vsel %vm402_vm1, %v971_v53, 0.0  ;;  %v1296_v6 = vsel %vm402_vm1, %v1229_v60, 0.0 }
 0x157   : > { %v1039_v57 = vadd.f32 %v1038_v55, %v970_v52  ;;  %v1297_v14 = vadd.f32 %v1296_v6, %v1228_v4 }
 0x158   : > { %v519_v59 = vpop.f32.mrf.mxu0 }
 0x159   : > { %v799_v61 = vpop.f32.mrf.mxu2  ;;  %v888_v62 = vpop.f32.mrf.mxu3  ;;  %1040 = vadd.xlane.f32.xlu1 %v1039_v57  ;;  %1294 = vadd.xlane.f32.xlu0 %v1293_v58  ;;  %v520_v3 = vadd.f32 %v2056_v56, %v519_v59 }
 0x15a   : > { %v2157_v0 = vadd.f32 %v799_v61, %v2112_v8  ;;  %v889_v1 = vadd.f32 %v888_v62, %v2114_v9  ;;  %v615_v34 = vpop.f32.mrf.mxu1 }
 0x15b   : > { %v1805_v2 = vpop.eup %1804  ;;  %v609_v13 = vadd.f32 %v608_v28, %v520_v3 }
 0x15c   : > { %1487 = vst.msk [vmem:[%s2122_s26 + $0x38] sm:$0xff] %vm402_vm1, %v889_v1  ;;  %v675_v5 = vpack.c.bf16 %v1805_v2, %v1803_v63  ;;  %v1230_v7 = vmul.f32 %v2157_v0, %v2157_v0  ;;  %v1231_v10 = vmul.f32 %v889_v1, %v889_v1  ;;  %v973_v17 = vand.u32 2147483647, %v889_v1 }
 0x15d   : > { %1806 = vtanh.f32 %v609_v13  ;;  %v972_v25 = vand.u32 2147483647, %v2157_v0 }
 0x15e   : > { %841 = vmatmul.bf16.gmra.mxu2 %v675_v5  ;;  %930 = vmatmul.bf16.gmra.mxu3 %v675_v5  ;;  %v1300_v12 = vsel %vm402_vm1, %v1231_v10, 0.0  ;;  %v1042_v26 = vsel %vm402_vm1, %v973_v17, 0.0 }
 0x15f   : > { %v1301_v15 = vadd.f32 %v1300_v12, %v1230_v7  ;;  %v1043_v35 = vadd.f32 %v1042_v26, %v972_v25 }
 0x160   : > { %v521_v18 = vpop.f32.mrf.mxu0 }
 0x161   : > { %v522_v19 = vadd.f32 %v2056_v56, %v521_v18  ;;  %v802_v20 = vpop.f32.mrf.mxu2  ;;  %v891_v21 = vpop.f32.mrf.mxu3  ;;  %1298 = vadd.xlane.f32.xlu1 %v1297_v14  ;;  %1302 = vadd.xlane.f32.xlu2 %v1301_v15 }
 0x162   : > { %v2171_v22 = vadd.f32 %v802_v20, %v2112_v8  ;;  %v892_v23 = vadd.f32 %v891_v21, %v2114_v9  ;;  %v618_v59 = vpop.f32.mrf.mxu1 }
 0x163   : > { %v611_v24 = vadd.f32 %v610_v49, %v522_v19  ;;  %v1807_v39 = vpop.eup %1806 }
 0x164   : > { %1489 = vst.msk [vmem:[%s2122_s26 + $0x48] sm:$0xff] %vm402_vm1, %v892_v23  ;;  %v974_v27 = vand.u32 2147483647, %v2171_v22  ;;  %v975_v28 = vand.u32 2147483647, %v892_v23  ;;  %v1232_v29 = vmul.f32 %v2171_v22, %v2171_v22  ;;  %v1233_v30 = vmul.f32 %v892_v23, %v892_v23 }
 0x165   : > { %1808 = vtanh.f32 %v611_v24 }
 0x166   : > { %v1046_v31 = vsel %vm402_vm1, %v975_v28, 0.0  ;;  %v1304_v33 = vsel %vm402_vm1, %v1233_v30, 0.0 }
 0x167   : > { %v1047_v36 = vadd.f32 %v1046_v31, %v974_v27  ;;  %v1305_v37 = vadd.f32 %v1304_v33, %v1232_v29 }
 0x168   : > { %v524_v38 = vpop.f32.mrf.mxu0 }
 0x169   : > { %v804_v40 = vpop.f32.mrf.mxu2  ;;  %v893_v41 = vpop.f32.mrf.mxu3  ;;  %1044 = vadd.xlane.f32.xlu1 %v1043_v35  ;;  %1048 = vadd.xlane.f32.xlu2 %v1047_v36  ;;  %v525_v45 = vadd.f32 %v2056_v56, %v524_v38 }
 0x16a   : > { %v2184_v42 = vadd.f32 %v804_v40, %v2112_v8  ;;  %v894_v43 = vadd.f32 %v893_v41, %v2114_v9  ;;  %1306 = vadd.xlane.f32.xlu0 %v1305_v37  ;;  %v620_v20 = vpop.f32.mrf.mxu1 }
 0x16b   : > { %v1809_v44 = vpop.eup %1808  ;;  %v614_v53 = vadd.f32 %v613_v11, %v525_v45 }
 0x16c   : > { %1491 = vst.msk [vmem:[%s2122_s26 + $0x58] sm:$0xff] %vm402_vm1, %v894_v43  ;;  %v676_v46 = vpack.c.bf16 %v1809_v44, %v1807_v39  ;;  %v1234_v48 = vmul.f32 %v2184_v42, %v2184_v42  ;;  %v1235_v49 = vmul.f32 %v894_v43, %v894_v43  ;;  %v976_v50 = vand.u32 2147483647, %v2184_v42 }
 0x16d   : > { %v977_v51 = vand.u32 2147483647, %v894_v43  ;;  %1810 = vtanh.f32 %v614_v53 }
 0x16e   : > { %846 = vmatmul.bf16.gmra.mxu2 %v676_v46  ;;  %935 = vmatmul.bf16.gmra.mxu3 %v676_v46  ;;  %v1308_v52 = vsel %vm402_vm1, %v1235_v49, 0.0 }
 0x16f   : > { %v1309_v54 = vadd.f32 %v1308_v52, %v1234_v48  ;;  %v1050_v55 = vsel %vm402_vm1, %v977_v51, 0.0 }
 0x170   : > { %v526_v57 = vpop.f32.mrf.mxu0  ;;  %v1051_v58 = vadd.f32 %v1050_v55, %v976_v50 }
 0x171   : > { %v527_v60 = vadd.f32 %v2056_v56, %v526_v57  ;;  %v807_v61 = vpop.f32.mrf.mxu2  ;;  %v896_v62 = vpop.f32.mrf.mxu3  ;;  %1310 = vadd.xlane.f32.xlu1 %v1309_v54 }
 0x172   : > { %v2197_v63 = vadd.f32 %v807_v61, %v2112_v8  ;;  %v897_v1 = vadd.f32 %v896_v62, %v2114_v9  ;;  %1052 = vadd.xlane.f32.xlu2 %v1051_v58  ;;  %v623_v43 = vpop.f32.mrf.mxu1 }
 0x173   : > { %v616_v2 = vadd.f32 %v615_v34, %v527_v60  ;;  %v1811_v14 = vpop.eup %1810 }
 0x174   : > { %1493 = vst.msk [vmem:[%s2122_s26 + $0x68] sm:$0xff] %vm402_vm1, %v897_v1  ;;  %v1236_v3 = vmul.f32 %v2197_v63, %v2197_v63  ;;  %v1237_v4 = vmul.f32 %v897_v1, %v897_v1  ;;  %v978_v5 = vand.u32 2147483647, %v2197_v63  ;;  %v979_v6 = vand.u32 2147483647, %v897_v1 }
 0x175   : > { %1812 = vtanh.f32 %v616_v2 }
 0x176   : > { %v1312_v7 = vsel %vm402_vm1, %v1237_v4, 0.0  ;;  %v1054_v10 = vsel %vm402_vm1, %v979_v6, 0.0 }
 0x177   : > { %v1313_v11 = vadd.f32 %v1312_v7, %v1236_v3  ;;  %v1055_v12 = vadd.f32 %v1054_v10, %v978_v5 }
 0x178   : > { %v529_v13 = vpop.f32.mrf.mxu0 }
 0x179   : > { %v809_v15 = vpop.f32.mrf.mxu2  ;;  %v898_v17 = vpop.f32.mrf.mxu3  ;;  %1056 = vadd.xlane.f32.xlu0 %v1055_v12  ;;  %v530_v23 = vadd.f32 %v2056_v56, %v529_v13 }
 0x17a   : > { %v2208_v18 = vadd.f32 %v809_v15, %v2112_v8  ;;  %v899_v19 = vadd.f32 %v898_v17, %v2114_v9  ;;  %1314 = vadd.xlane.f32.xlu2 %v1313_v11  ;;  %v625_v5 = vpop.f32.mrf.mxu1 }
 0x17b   : > { %v1813_v21 = vpop.eup %1812  ;;  %v619_v30 = vadd.f32 %v618_v59, %v530_v23 }
 0x17c   : > { %1495 = vst.msk [vmem:[%s2122_s26 + $0x78] sm:$0xff] %vm402_vm1, %v899_v19  ;;  %v677_v24 = vpack.c.bf16 %v1813_v21, %v1811_v14  ;;  %v980_v25 = vand.u32 2147483647, %v2208_v18  ;;  %v981_v26 = vand.u32 2147483647, %v899_v19  ;;  %v1238_v27 = vmul.f32 %v2208_v18, %v2208_v18 }
 0x17d   : > { %v1239_v28 = vmul.f32 %v899_v19, %v899_v19  ;;  %1814 = vtanh.f32 %v619_v30 }
 0x17e   : > { %851 = vmatmul.bf16.gmra.mxu2 %v677_v24  ;;  %940 = vmatmul.bf16.gmra.mxu3 %v677_v24  ;;  %v1058_v29 = vsel %vm402_vm1, %v981_v26, 0.0 }
 0x17f   : > { %v1059_v31 = vadd.f32 %v1058_v29, %v980_v25  ;;  %v1316_v33 = vsel %vm402_vm1, %v1239_v28, 0.0 }
 0x180   : > { %v531_v34 = vpop.f32.mrf.mxu0  ;;  %v1317_v35 = vadd.f32 %v1316_v33, %v1238_v27 }
 0x181   : > { %v532_v36 = vadd.f32 %v2056_v56, %v531_v34  ;;  %v812_v37 = vpop.f32.mrf.mxu2  ;;  %v901_v38 = vpop.f32.mrf.mxu3  ;;  %1060 = vadd.xlane.f32.xlu1 %v1059_v31 }
 0x182   : > { %v2221_v39 = vadd.f32 %v812_v37, %v2112_v8  ;;  %v902_v40 = vadd.f32 %v901_v38, %v2114_v9  ;;  %1318 = vadd.xlane.f32.xlu0 %v1317_v35  ;;  %v628_v31 = vpop.f32.mrf.mxu1 }
 0x183   : > { %v621_v41 = vadd.f32 %v620_v20, %v532_v36  ;;  %v1815_v54 = vpop.eup %1814 }
 0x184   : > { %1497 = vst.msk [vmem:[%s2122_s26 + $0x88] sm:$0xff] %vm402_vm1, %v902_v40  ;;  %v1240_v44 = vmul.f32 %v2221_v39, %v2221_v39  ;;  %v1241_v45 = vmul.f32 %v902_v40, %v902_v40  ;;  %v982_v46 = vand.u32 2147483647, %v2221_v39  ;;  %v983_v48 = vand.u32 2147483647, %v902_v40 }
 0x185   : > { %1816 = vtanh.f32 %v621_v41 }
 0x186   : > { %v1320_v49 = vsel %vm402_vm1, %v1241_v45, 0.0  ;;  %v1062_v50 = vsel %vm402_vm1, %v983_v48, 0.0 }
 0x187   : > { %v1321_v51 = vadd.f32 %v1320_v49, %v1240_v44  ;;  %v1063_v52 = vadd.f32 %v1062_v50, %v982_v46 }
 0x188   : > { %v534_v53 = vpop.f32.mrf.mxu0 }
 0x189   : > { %v814_v55 = vpop.f32.mrf.mxu2  ;;  %v903_v57 = vpop.f32.mrf.mxu3  ;;  %1322 = vadd.xlane.f32.xlu1 %v1321_v51  ;;  %1064 = vadd.xlane.f32.xlu2 %v1063_v52  ;;  %v535_v61 = vadd.f32 %v2056_v56, %v534_v53 }
 0x18a   : > { %v2232_v58 = vadd.f32 %v814_v55, %v2112_v8  ;;  %v904_v59 = vadd.f32 %v903_v57, %v2114_v9 }
 0x18b   : > { %v1817_v60 = vpop.eup %1816  ;;  %v624_v7 = vadd.f32 %v623_v43, %v535_v61 }
 0x18c   : > { %1499 = vst.msk [vmem:[%s2122_s26 + $0x98] sm:$0xff] %vm402_vm1, %v904_v59  ;;  %v678_v62 = vpack.c.bf16 %v1817_v60, %v1815_v54  ;;  %v1242_v1 = vmul.f32 %v2232_v58, %v2232_v58  ;;  %v1243_v2 = vmul.f32 %v904_v59, %v904_v59  ;;  %v984_v3 = vand.u32 2147483647, %v2232_v58  ;;  %v630_v60 = vpop.f32.mrf.mxu1 }
 0x18d   : > { %v985_v4 = vand.u32 2147483647, %v904_v59  ;;  %1818 = vtanh.f32 %v624_v7 }
 0x18e   : > { %856 = vmatmul.bf16.gmra.mxu2 %v678_v62  ;;  %945 = vmatmul.bf16.gmra.mxu3 %v678_v62  ;;  %v1324_v6 = vsel %vm402_vm1, %v1243_v2, 0.0 }
 0x18f   : > { %v1325_v10 = vadd.f32 %v1324_v6, %v1242_v1  ;;  %v1066_v11 = vsel %vm402_vm1, %v985_v4, 0.0 }
 0x190   : > { %v536_v12 = vpop.f32.mrf.mxu0  ;;  %v1067_v13 = vadd.f32 %v1066_v11, %v984_v3 }
 0x191   : > { %v537_v14 = vadd.f32 %v2056_v56, %v536_v12  ;;  %v817_v15 = vpop.f32.mrf.mxu2  ;;  %v906_v17 = vpop.f32.mrf.mxu3  ;;  %1326 = vadd.xlane.f32.xlu2 %v1325_v10 }
 0x192   : > { %v2245_v19 = vadd.f32 %v817_v15, %v2112_v8  ;;  %v907_v20 = vadd.f32 %v906_v17, %v2114_v9  ;;  %1068 = vadd.xlane.f32.xlu0 %v1067_v13 }
 0x193   : > { %v626_v21 = vadd.f32 %v625_v5, %v537_v14  ;;  %v1819_v34 = vpop.eup %1818 }
 0x194   : > { %1501 = vst.msk [vmem:[%s2122_s26 + $0xa8] sm:$0xff] %vm402_vm1, %v907_v20  ;;  %v986_v23 = vand.u32 2147483647, %v2245_v19  ;;  %v987_v24 = vand.u32 2147483647, %v907_v20  ;;  %v1244_v25 = vmul.f32 %v2245_v19, %v2245_v19  ;;  %v1245_v26 = vmul.f32 %v907_v20, %v907_v20 }
 0x195   : > { %1820 = vtanh.f32 %v626_v21 }
 0x196   : > { %v1070_v27 = vsel %vm402_vm1, %v987_v24, 0.0  ;;  %v1328_v28 = vsel %vm402_vm1, %v1245_v26, 0.0 }
 0x197   : > { %v1071_v29 = vadd.f32 %v1070_v27, %v986_v23  ;;  %v1329_v30 = vadd.f32 %v1328_v28, %v1244_v25 }
 0x198   : > { %v539_v33 = vpop.f32.mrf.mxu0 }
 0x199   : > { %v819_v35 = vpop.f32.mrf.mxu2  ;;  %v908_v36 = vpop.f32.mrf.mxu3  ;;  %1072 = vadd.xlane.f32.xlu1 %v1071_v29  ;;  %v540_v41 = vadd.f32 %v2056_v56, %v539_v33 }
 0x19a   : > { %v2256_v37 = vadd.f32 %v819_v35, %v2112_v8  ;;  %v909_v38 = vadd.f32 %v908_v36, %v2114_v9  ;;  %1330 = vadd.xlane.f32.xlu0 %v1329_v30  ;;  %v961_v35 = vlaneseq }
 0x19b   : > { %v1821_v40 = vpop.eup %1820  ;;  %v629_v50 = vadd.f32 %v628_v31, %v540_v41 }
 0x19c   : > { %1503 = vst.msk [vmem:[%s2122_s26 + $0xb8] sm:$0xff] %vm402_vm1, %v909_v38  ;;  %v679_v43 = vpack.c.bf16 %v1821_v40, %v1819_v34  ;;  %v1246_v44 = vmul.f32 %v2256_v37, %v2256_v37  ;;  %v1247_v45 = vmul.f32 %v909_v38, %v909_v38  ;;  %v988_v46 = vand.u32 2147483647, %v2256_v37 }
 0x19d   : > { %v989_v48 = vand.u32 2147483647, %v909_v38  ;;  %1822 = vtanh.f32 %v629_v50 }
 0x19e   : > { %861 = vmatmul.bf16.gmra.mxu2 %v679_v43  ;;  %950 = vmatmul.bf16.gmra.mxu3 %v679_v43  ;;  %v1332_v49 = vsel %vm402_vm1, %v1247_v45, 0.0  ;;  %v2301_v45 = vand.u32 127, %v961_v35 }
 0x19f   : > { %v1333_v51 = vadd.f32 %v1332_v49, %v1246_v44  ;;  %v1074_v52 = vsel %vm402_vm1, %v989_v48, 0.0 }
 0x1a0   : > { %v541_v53 = vpop.f32.mrf.mxu0  ;;  %v1075_v54 = vadd.f32 %v1074_v52, %v988_v46  ;;  %vm964_vm2 = vcmp.eq.s32.totalorder %v2301_v45, 0  ;;  %vm1222_vm3 = vcmp.eq.s32.totalorder %v2301_v45, 1 }
 0x1a1   : > { %v542_v55 = vadd.f32 %v2056_v56, %v541_v53  ;;  %v822_v57 = vpop.f32.mrf.mxu2  ;;  %v911_v59 = vpop.f32.mrf.mxu3  ;;  %1334 = vadd.xlane.f32.xlu1 %v1333_v51 }
 0x1a2   : > { %v2269_v61 = vadd.f32 %v822_v57, %v2112_v8  ;;  %v912_v62 = vadd.f32 %v911_v59, %v2114_v9  ;;  %1076 = vadd.xlane.f32.xlu2 %v1075_v54 }
 0x1a3   : > { %v631_v1 = vadd.f32 %v630_v60, %v542_v55  ;;  %v1823_v11 = vpop.eup %1822 }
 0x1a4   : > { %1505 = vst.msk [vmem:[%s2122_s26 + $0xc8] sm:$0xff] %vm402_vm1, %v912_v62  ;;  %v1248_v2 = vmul.f32 %v2269_v61, %v2269_v61  ;;  %v1249_v3 = vmul.f32 %v912_v62, %v912_v62  ;;  %v990_v56 = vand.u32 2147483647, %v2269_v61  ;;  %v991_v4 = vand.u32 2147483647, %v912_v62 }
 0x1a5   : > { %1824 = vtanh.f32 %v631_v1 }
 0x1a6   : > { %v1336_v5 = vsel %vm402_vm1, %v1249_v3, 0.0  ;;  %v1078_v6 = vsel %vm402_vm1, %v991_v4, 0.0 }
 0x1a7   : > { %v1337_v7 = vadd.f32 %v1336_v5, %v1248_v2  ;;  %v1079_v10 = vadd.f32 %v1078_v6, %v990_v56 }
 0x1a9   : > { %v824_v12 = vpop.f32.mrf.mxu2  ;;  %v913_v13 = vpop.f32.mrf.mxu3  ;;  %1080 = vadd.xlane.f32.xlu0 %v1079_v10 }
 0x1aa   : > { %v2280_v14 = vadd.f32 %v824_v12, %v2112_v8  ;;  %v914_v15 = vadd.f32 %v913_v13, %v2114_v9  ;;  %1338 = vadd.xlane.f32.xlu2 %v1337_v7 }
 0x1ab   : > { %v1825_v17 = vpop.eup %1824 }
 0x1ac   : > { %1507 = vst.msk [vmem:[%s2122_s26 + $0xd8] sm:$0xff] %vm402_vm1, %v914_v15  ;;  %v680_v20 = vpack.c.bf16 %v1825_v17, %v1823_v11  ;;  %v992_v21 = vand.u32 2147483647, %v2280_v14  ;;  %v993_v23 = vand.u32 2147483647, %v914_v15  ;;  %v1250_v24 = vmul.f32 %v2280_v14, %v2280_v14 }
 0x1ad   : > { %v1251_v25 = vmul.f32 %v914_v15, %v914_v15 }
 0x1ae   : > { %866 = vmatmul.bf16.gmra.mxu2 %v680_v20  ;;  %955 = vmatmul.bf16.gmra.mxu3 %v680_v20  ;;  %v1082_v26 = vsel %vm402_vm1, %v993_v23, 0.0 }
 0x1af   : > { %v1083_v27 = vadd.f32 %v1082_v26, %v992_v21  ;;  %v1340_v28 = vsel %vm402_vm1, %v1251_v25, 0.0 }
 0x1b0   : > { %v1341_v29 = vadd.f32 %v1340_v28, %v1250_v24 }
 0x1b1   : > { %v827_v30 = vpop.f32.mrf.mxu2  ;;  %v916_v31 = vpop.f32.mrf.mxu3  ;;  %1084 = vadd.xlane.f32.xlu1 %v1083_v27 }
 0x1b2   : > { %v2291_v33 = vadd.f32 %v827_v30, %v2112_v8  ;;  %v917_v34 = vadd.f32 %v916_v31, %v2114_v9  ;;  %1342 = vadd.xlane.f32.xlu0 %v1341_v29 }
 0x1b4   : > { %1509 = vst.msk [vmem:[%s2122_s26 + $0xe8] sm:$0xff] %vm402_vm1, %v917_v34  ;;  %v1252_v36 = vmul.f32 %v2291_v33, %v2291_v33  ;;  %v1253_v38 = vmul.f32 %v917_v34, %v917_v34  ;;  %v994_v40 = vand.u32 2147483647, %v2291_v33  ;;  %v995_v41 = vand.u32 2147483647, %v917_v34 }
 0x1b6   : > { %v1344_v43 = vsel %vm402_vm1, %v1253_v38, 0.0  ;;  %v1086_v44 = vsel %vm402_vm1, %v995_v41, 0.0 }
 0x1b7   : > { %v1345_v46 = vadd.f32 %v1344_v43, %v1252_v36  ;;  %v1087_v48 = vadd.f32 %v1086_v44, %v994_v40 }
 0x1b9   : > { %v829_v49 = vpop.f32.mrf.mxu2  ;;  %v918_v50 = vpop.f32.mrf.mxu3  ;;  %1346 = vadd.xlane.f32.xlu1 %v1345_v46  ;;  %1088 = vadd.xlane.f32.xlu2 %v1087_v48 }
 0x1ba   : > { %v2304_v51 = vadd.f32 %v829_v49, %v2112_v8  ;;  %v919_v52 = vadd.f32 %v918_v50, %v2114_v9 }
 0x1bc   : > { %1511 = vst.msk [vmem:[%s2122_s26 + $0xf8] sm:$0xff] %vm402_vm1, %v919_v52  ;;  %v1291_v53 = vpop.xlane.xlu2 %1290  ;;  %v1033_v54 = vpop.xlane.xlu0 %1032  ;;  %v1254_v55 = vmul.f32 %v2304_v51, %v2304_v51  ;;  %v1255_v57 = vmul.f32 %v919_v52, %v919_v52  ;;  %v996_v59 = vand.u32 2147483647, %v2304_v51  ;;  %v997_v60 = vand.u32 2147483647, %v919_v52 }
 0x1bd   : > { %v1158_v62 = vsel %vm964_vm2, %v1033_v54, %v2125_v16 }
 0x1be   : > { %v1416_v1 = vsel %vm1222_vm3, %v1291_v53, %v1158_v62  ;;  %v1348_v2 = vsel %vm402_vm1, %v1255_v57, 0.0  ;;  %v1090_v3 = vsel %vm402_vm1, %v997_v60, 0.0 }
 0x1bf   : > { %1480 = vst [vmem:[%s2122_s26] sm:$0xff] %v1416_v1  ;;  %v1349_v56 = vadd.f32 %v1348_v2, %v1254_v55  ;;  %v1091_v4 = vadd.f32 %v1090_v3, %v996_v59 }
 0x1c1   : > { %v832_v5 = vpop.f32.mrf.mxu2  ;;  %v921_v6 = vpop.f32.mrf.mxu3  ;;  %1350 = vadd.xlane.f32.xlu2 %v1349_v56  ;;  %1092 = vadd.xlane.f32.xlu0 %v1091_v4 }
 0x1c2   : > { %v2323_v7 = vadd.f32 %v832_v5, %v2112_v8  ;;  %v922_v10 = vadd.f32 %v921_v6, %v2114_v9 }
 0x1c4   : > { %1513 = vst.msk [vmem:[%s2122_s26 + $0x108] sm:$0xff] %vm402_vm1, %v922_v10  ;;  %v1037_v16 = vpop.xlane.xlu0 %1036  ;;  %v998_v11 = vand.u32 2147483647, %v2323_v7  ;;  %v999_v12 = vand.u32 2147483647, %v922_v10  ;;  %v1256_v13 = vmul.f32 %v2323_v7, %v2323_v7  ;;  %v1257_v15 = vmul.f32 %v922_v10, %v922_v10 }
 0x1c5   : > { %v1160_v28 = vsel %vm964_vm2, %v1037_v16, %v2136_v32 }
 0x1c6   : > { %v1094_v17 = vsel %vm402_vm1, %v999_v12, 0.0  ;;  %v1352_v20 = vsel %vm402_vm1, %v1257_v15, 0.0 }
 0x1c7   : > { %v1095_v21 = vadd.f32 %v1094_v17, %v998_v11  ;;  %v1353_v23 = vadd.f32 %v1352_v20, %v1256_v13 }
 0x1c9   : > { %v834_v24 = vpop.f32.mrf.mxu2  ;;  %v923_v25 = vpop.f32.mrf.mxu3  ;;  %1096 = vadd.xlane.f32.xlu1 %v1095_v21  ;;  %1354 = vadd.xlane.f32.xlu0 %v1353_v23 }
 0x1ca   : > { %v2334_v26 = vadd.f32 %v834_v24, %v2112_v8  ;;  %v924_v27 = vadd.f32 %v923_v25, %v2114_v9 }
 0x1cc   : > { %1515 = vst.msk [vmem:[%s2122_s26 + $0x118] sm:$0xff] %vm402_vm1, %v924_v27  ;;  %v1041_v29 = vpop.xlane.xlu1 %1040  ;;  %v1295_v30 = vpop.xlane.xlu0 %1294  ;;  %v1258_v31 = vmul.f32 %v2334_v26, %v2334_v26  ;;  %v1259_v34 = vmul.f32 %v924_v27, %v924_v27  ;;  %v1000_v35 = vand.u32 2147483647, %v2334_v26  ;;  %v1001_v36 = vand.u32 2147483647, %v924_v27 }
 0x1cd   : > { %v1418_v38 = vsel %vm1222_vm3, %v1295_v30, %v1160_v28  ;;  %v1162_v50 = vsel %vm964_vm2, %v1041_v29, %v2146_v47 }
 0x1ce   : > { %1482 = vst [vmem:[%s2122_s26 + $0x10] sm:$0xff] %v1418_v38  ;;  %v1356_v40 = vsel %vm402_vm1, %v1259_v34, 0.0  ;;  %v1098_v32 = vsel %vm402_vm1, %v1001_v36, 0.0 }
 0x1cf   : > { %v1357_v41 = vadd.f32 %v1356_v40, %v1258_v31  ;;  %v1099_v43 = vadd.f32 %v1098_v32, %v1000_v35 }
 0x1d1   : > { %v837_v44 = vpop.f32.mrf.mxu2  ;;  %v926_v46 = vpop.f32.mrf.mxu3  ;;  %1358 = vadd.xlane.f32.xlu1 %v1357_v41  ;;  %1100 = vadd.xlane.f32.xlu2 %v1099_v43 }
 0x1d2   : > { %v2351_v48 = vadd.f32 %v837_v44, %v2112_v8  ;;  %v927_v49 = vadd.f32 %v926_v46, %v2114_v9 }
 0x1d4   : > { %1517 = vst.msk [vmem:[%s2122_s26 + $0x128] sm:$0xff] %vm402_vm1, %v927_v49  ;;  %v1299_v52 = vpop.xlane.xlu1 %1298  ;;  %v1303_v53 = vpop.xlane.xlu2 %1302  ;;  %v1260_v54 = vmul.f32 %v2351_v48, %v2351_v48  ;;  %v1261_v55 = vmul.f32 %v927_v49, %v927_v49  ;;  %v1002_v57 = vand.u32 2147483647, %v2351_v48  ;;  %v1003_v59 = vand.u32 2147483647, %v927_v49 }
 0x1d5   : > { %v1420_v60 = vsel %vm1222_vm3, %v1299_v52, %v1162_v50 }
 0x1d6   : > { %1484 = vst [vmem:[%s2122_s26 + $0x20] sm:$0xff] %v1420_v60  ;;  %v1360_v62 = vsel %vm402_vm1, %v1261_v55, 0.0  ;;  %v1102_v47 = vsel %vm402_vm1, %v1003_v59, 0.0 }
 0x1d7   : > { %v1361_v1 = vadd.f32 %v1360_v62, %v1260_v54  ;;  %v1103_v2 = vadd.f32 %v1102_v47, %v1002_v57 }
 0x1d9   : > { %v839_v3 = vpop.f32.mrf.mxu2  ;;  %v928_v56 = vpop.f32.mrf.mxu3  ;;  %1362 = vadd.xlane.f32.xlu2 %v1361_v1  ;;  %1104 = vadd.xlane.f32.xlu0 %v1103_v2 }
 0x1da   : > { %v2368_v4 = vadd.f32 %v839_v3, %v2112_v8  ;;  %v929_v5 = vadd.f32 %v928_v56, %v2114_v9 }
 0x1dc   : > { %1519 = vst.msk [vmem:[%s2122_s26 + $0x138] sm:$0xff] %vm402_vm1, %v929_v5  ;;  %v1045_v6 = vpop.xlane.xlu1 %1044  ;;  %v1049_v10 = vpop.xlane.xlu2 %1048  ;;  %v1004_v16 = vand.u32 2147483647, %v2368_v4  ;;  %v1005_v11 = vand.u32 2147483647, %v929_v5  ;;  %v1262_v12 = vmul.f32 %v2368_v4, %v2368_v4  ;;  %v1263_v13 = vmul.f32 %v929_v5, %v929_v5 }
 0x1dd   : > { %v1164_v15 = vsel %vm964_vm2, %v1045_v6, %v2157_v0  ;;  %v1166_v17 = vsel %vm964_vm2, %v1049_v10, %v2171_v22  ;;  %v1307_v20 = vpop.xlane.xlu0 %1306 }
 0x1de   : > { %v1422_v21 = vsel %vm1222_vm3, %v1303_v53, %v1164_v15  ;;  %v1424_v23 = vsel %vm1222_vm3, %v1307_v20, %v1166_v17  ;;  %v1106_v24 = vsel %vm402_vm1, %v1005_v11, 0.0  ;;  %v1364_v25 = vsel %vm402_vm1, %v1263_v13, 0.0 }
 0x1df   : > { %1486 = vst [vmem:[%s2122_s26 + $0x30] sm:$0xff] %v1422_v21  ;;  %v1107_v27 = vadd.f32 %v1106_v24, %v1004_v16  ;;  %v1365_v28 = vadd.f32 %v1364_v25, %v1262_v12 }
 0x1e0   : > { %1488 = vst [vmem:[%s2122_s26 + $0x40] sm:$0xff] %v1424_v23 }
 0x1e1   : > { %v842_v0 = vpop.f32.mrf.mxu2  ;;  %v931_v29 = vpop.f32.mrf.mxu3  ;;  %1108 = vadd.xlane.f32.xlu1 %v1107_v27  ;;  %1366 = vadd.xlane.f32.xlu0 %v1365_v28 }
 0x1e2   : > { %v2391_v22 = vadd.f32 %v842_v0, %v2112_v8  ;;  %v932_v30 = vadd.f32 %v931_v29, %v2114_v9 }
 0x1e4   : > { %1521 = vst.msk [vmem:[%s2122_s26 + $0x148] sm:$0xff] %vm402_vm1, %v932_v30  ;;  %v1311_v31 = vpop.xlane.xlu1 %1310  ;;  %v1264_v34 = vmul.f32 %v2391_v22, %v2391_v22  ;;  %v1265_v35 = vmul.f32 %v932_v30, %v932_v30  ;;  %v1006_v36 = vand.u32 2147483647, %v2391_v22  ;;  %v1007_v38 = vand.u32 2147483647, %v932_v30 }
 0x1e5   : > { %v1053_v40 = vpop.xlane.xlu2 %1052 }
 0x1e6   : > { %v1168_v32 = vsel %vm964_vm2, %v1053_v40, %v2184_v42  ;;  %v1368_v41 = vsel %vm402_vm1, %v1265_v35, 0.0  ;;  %v1110_v43 = vsel %vm402_vm1, %v1007_v38, 0.0 }
 0x1e7   : > { %v1426_v44 = vsel %vm1222_vm3, %v1311_v31, %v1168_v32  ;;  %v1369_v46 = vadd.f32 %v1368_v41, %v1264_v34  ;;  %v1111_v49 = vadd.f32 %v1110_v43, %v1006_v36 }
 0x1e8   : > { %1490 = vst [vmem:[%s2122_s26 + $0x50] sm:$0xff] %v1426_v44 }
 0x1e9   : > { %v844_v50 = vpop.f32.mrf.mxu2  ;;  %v933_v52 = vpop.f32.mrf.mxu3  ;;  %1370 = vadd.xlane.f32.xlu1 %v1369_v46  ;;  %1112 = vadd.xlane.f32.xlu2 %v1111_v49 }
 0x1ea   : > { %v2408_v53 = vadd.f32 %v844_v50, %v2112_v8  ;;  %v934_v42 = vadd.f32 %v933_v52, %v2114_v9 }
 0x1ec   : > { %1523 = vst.msk [vmem:[%s2122_s26 + $0x158] sm:$0xff] %vm402_vm1, %v934_v42  ;;  %v1057_v54 = vpop.xlane.xlu0 %1056  ;;  %v1266_v55 = vmul.f32 %v2408_v53, %v2408_v53  ;;  %v1267_v57 = vmul.f32 %v934_v42, %v934_v42  ;;  %v1008_v59 = vand.u32 2147483647, %v2408_v53  ;;  %v1009_v60 = vand.u32 2147483647, %v934_v42 }
 0x1ed   : > { %v1315_v62 = vpop.xlane.xlu2 %1314  ;;  %v1170_v47 = vsel %vm964_vm2, %v1057_v54, %v2197_v63 }
 0x1ee   : > { %v1428_v1 = vsel %vm1222_vm3, %v1315_v62, %v1170_v47  ;;  %v1372_v2 = vsel %vm402_vm1, %v1267_v57, 0.0  ;;  %v1114_v3 = vsel %vm402_vm1, %v1009_v60, 0.0 }
 0x1ef   : > { %1492 = vst [vmem:[%s2122_s26 + $0x60] sm:$0xff] %v1428_v1  ;;  %v1373_v56 = vadd.f32 %v1372_v2, %v1266_v55  ;;  %v1115_v5 = vadd.f32 %v1114_v3, %v1008_v59 }
 0x1f1   : > { %v847_v6 = vpop.f32.mrf.mxu2  ;;  %v936_v10 = vpop.f32.mrf.mxu3  ;;  %1374 = vadd.xlane.f32.xlu2 %v1373_v56  ;;  %1116 = vadd.xlane.f32.xlu0 %v1115_v5 }
 0x1f2   : > { %v2425_v16 = vadd.f32 %v847_v6, %v2112_v8  ;;  %v937_v63 = vadd.f32 %v936_v10, %v2114_v9 }
 0x1f4   : > { %1525 = vst.msk [vmem:[%s2122_s26 + $0x168] sm:$0xff] %vm402_vm1, %v937_v63  ;;  %v1061_v11 = vpop.xlane.xlu1 %1060  ;;  %v1010_v12 = vand.u32 2147483647, %v2425_v16  ;;  %v1011_v13 = vand.u32 2147483647, %v937_v63  ;;  %v1268_v15 = vmul.f32 %v2425_v16, %v2425_v16  ;;  %v1269_v17 = vmul.f32 %v937_v63, %v937_v63 }
 0x1f5   : > { %v1172_v20 = vsel %vm964_vm2, %v1061_v11, %v2208_v18  ;;  %v1319_v21 = vpop.xlane.xlu0 %1318 }
 0x1f6   : > { %v1430_v23 = vsel %vm1222_vm3, %v1319_v21, %v1172_v20  ;;  %v1118_v24 = vsel %vm402_vm1, %v1011_v13, 0.0  ;;  %v1376_v25 = vsel %vm402_vm1, %v1269_v17, 0.0 }
 0x1f7   : > { %1494 = vst [vmem:[%s2122_s26 + $0x70] sm:$0xff] %v1430_v23  ;;  %v1119_v27 = vadd.f32 %v1118_v24, %v1010_v12  ;;  %v1377_v28 = vadd.f32 %v1376_v25, %v1268_v15 }
 0x1f9   : > { %v849_v0 = vpop.f32.mrf.mxu2  ;;  %v938_v29 = vpop.f32.mrf.mxu3  ;;  %1120 = vadd.xlane.f32.xlu1 %v1119_v27  ;;  %1378 = vadd.xlane.f32.xlu0 %v1377_v28 }
 0x1fa   : > { %v2442_v30 = vadd.f32 %v849_v0, %v2112_v8  ;;  %v939_v18 = vadd.f32 %v938_v29, %v2114_v9 }
 0x1fc   : > { %1527 = vst.msk [vmem:[%s2122_s26 + $0x178] sm:$0xff] %vm402_vm1, %v939_v18  ;;  %v1323_v31 = vpop.xlane.xlu1 %1322  ;;  %v1065_v34 = vpop.xlane.xlu2 %1064  ;;  %v1270_v35 = vmul.f32 %v2442_v30, %v2442_v30  ;;  %v1271_v36 = vmul.f32 %v939_v18, %v939_v18  ;;  %v1012_v38 = vand.u32 2147483647, %v2442_v30  ;;  %v1013_v40 = vand.u32 2147483647, %v939_v18 }
 0x1fd   : > { %v1174_v32 = vsel %vm964_vm2, %v1065_v34, %v2221_v39 }
 0x1fe   : > { %v1432_v41 = vsel %vm1222_vm3, %v1323_v31, %v1174_v32  ;;  %v1380_v43 = vsel %vm402_vm1, %v1271_v36, 0.0  ;;  %v1122_v44 = vsel %vm402_vm1, %v1013_v40, 0.0 }
 0x1ff   : > { %1496 = vst [vmem:[%s2122_s26 + $0x80] sm:$0xff] %v1432_v41  ;;  %v1381_v46 = vadd.f32 %v1380_v43, %v1270_v35  ;;  %v1123_v49 = vadd.f32 %v1122_v44, %v1012_v38 }
 0x201   : > { %v852_v50 = vpop.f32.mrf.mxu2  ;;  %v941_v52 = vpop.f32.mrf.mxu3  ;;  %1382 = vadd.xlane.f32.xlu1 %v1381_v46  ;;  %1124 = vadd.xlane.f32.xlu2 %v1123_v49 }
 0x202   : > { %v2459_v42 = vadd.f32 %v852_v50, %v2112_v8  ;;  %v942_v39 = vadd.f32 %v941_v52, %v2114_v9 }
 0x204   : > { %1529 = vst.msk [vmem:[%s2122_s26 + $0x188] sm:$0xff] %vm402_vm1, %v942_v39  ;;  %v1327_v54 = vpop.xlane.xlu2 %1326  ;;  %v1272_v55 = vmul.f32 %v2459_v42, %v2459_v42  ;;  %v1273_v57 = vmul.f32 %v942_v39, %v942_v39  ;;  %v1014_v59 = vand.u32 2147483647, %v2459_v42  ;;  %v1015_v60 = vand.u32 2147483647, %v942_v39 }
 0x205   : > { %v1069_v62 = vpop.xlane.xlu0 %1068 }
 0x206   : > { %v1176_v47 = vsel %vm964_vm2, %v1069_v62, %v2232_v58  ;;  %v1384_v1 = vsel %vm402_vm1, %v1273_v57, 0.0  ;;  %v1126_v2 = vsel %vm402_vm1, %v1015_v60, 0.0 }
 0x207   : > { %v1434_v3 = vsel %vm1222_vm3, %v1327_v54, %v1176_v47  ;;  %v1385_v56 = vadd.f32 %v1384_v1, %v1272_v55  ;;  %v1127_v5 = vadd.f32 %v1126_v2, %v1014_v59 }
 0x208   : > { %1498 = vst [vmem:[%s2122_s26 + $0x90] sm:$0xff] %v1434_v3 }
 0x209   : > { %v854_v6 = vpop.f32.mrf.mxu2  ;;  %v943_v10 = vpop.f32.mrf.mxu3  ;;  %1386 = vadd.xlane.f32.xlu2 %v1385_v56  ;;  %1128 = vadd.xlane.f32.xlu0 %v1127_v5 }
 0x20a   : > { %v2476_v63 = vadd.f32 %v854_v6, %v2112_v8  ;;  %v944_v58 = vadd.f32 %v943_v10, %v2114_v9 }
 0x20c   : > { %1531 = vst.msk [vmem:[%s2122_s26 + $0x198] sm:$0xff] %vm402_vm1, %v944_v58  ;;  %v1073_v11 = vpop.xlane.xlu1 %1072  ;;  %v1016_v12 = vand.u32 2147483647, %v2476_v63  ;;  %v1017_v13 = vand.u32 2147483647, %v944_v58  ;;  %v1274_v15 = vmul.f32 %v2476_v63, %v2476_v63  ;;  %v1275_v17 = vmul.f32 %v944_v58, %v944_v58 }
 0x20d   : > { %v1178_v20 = vsel %vm964_vm2, %v1073_v11, %v2245_v19  ;;  %v1331_v21 = vpop.xlane.xlu0 %1330 }
 0x20e   : > { %v1436_v23 = vsel %vm1222_vm3, %v1331_v21, %v1178_v20  ;;  %v1130_v24 = vsel %vm402_vm1, %v1017_v13, 0.0  ;;  %v1388_v25 = vsel %vm402_vm1, %v1275_v17, 0.0 }
 0x20f   : > { %1500 = vst [vmem:[%s2122_s26 + $0xa0] sm:$0xff] %v1436_v23  ;;  %v1131_v27 = vadd.f32 %v1130_v24, %v1016_v12  ;;  %v1389_v28 = vadd.f32 %v1388_v25, %v1274_v15 }
 0x211   : > { %v857_v0 = vpop.f32.mrf.mxu2  ;;  %v946_v29 = vpop.f32.mrf.mxu3  ;;  %1132 = vadd.xlane.f32.xlu1 %v1131_v27  ;;  %1390 = vadd.xlane.f32.xlu0 %v1389_v28 }
 0x212   : > { %v2493_v18 = vadd.f32 %v857_v0, %v2112_v8  ;;  %v947_v19 = vadd.f32 %v946_v29, %v2114_v9 }
 0x214   : > { %1533 = vst.msk [vmem:[%s2122_s26 + $0x1a8] sm:$0xff] %vm402_vm1, %v947_v19  ;;  %v1335_v31 = vpop.xlane.xlu1 %1334  ;;  %v1276_v34 = vmul.f32 %v2493_v18, %v2493_v18  ;;  %v1277_v35 = vmul.f32 %v947_v19, %v947_v19  ;;  %v1018_v36 = vand.u32 2147483647, %v2493_v18  ;;  %v1019_v38 = vand.u32 2147483647, %v947_v19 }
 0x215   : > { %v1077_v40 = vpop.xlane.xlu2 %1076 }
 0x216   : > { %v1180_v32 = vsel %vm964_vm2, %v1077_v40, %v2256_v37  ;;  %v1392_v41 = vsel %vm402_vm1, %v1277_v35, 0.0  ;;  %v1134_v43 = vsel %vm402_vm1, %v1019_v38, 0.0 }
 0x217   : > { %v1438_v44 = vsel %vm1222_vm3, %v1335_v31, %v1180_v32  ;;  %v1393_v46 = vadd.f32 %v1392_v41, %v1276_v34  ;;  %v1135_v49 = vadd.f32 %v1134_v43, %v1018_v36 }
 0x218   : > { %1502 = vst [vmem:[%s2122_s26 + $0xb0] sm:$0xff] %v1438_v44 }
 0x219   : > { %v859_v50 = vpop.f32.mrf.mxu2  ;;  %v948_v52 = vpop.f32.mrf.mxu3  ;;  %1394 = vadd.xlane.f32.xlu1 %v1393_v46  ;;  %1136 = vadd.xlane.f32.xlu2 %v1135_v49 }
 0x21a   : > { %v2510_v39 = vadd.f32 %v859_v50, %v2112_v8  ;;  %v949_v37 = vadd.f32 %v948_v52, %v2114_v9 }
 0x21c   : > { %1535 = vst.msk [vmem:[%s2122_s26 + $0x1b8] sm:$0xff] %vm402_vm1, %v949_v37  ;;  %v1081_v54 = vpop.xlane.xlu0 %1080  ;;  %v1278_v55 = vmul.f32 %v2510_v39, %v2510_v39  ;;  %v1279_v57 = vmul.f32 %v949_v37, %v949_v37  ;;  %v1020_v59 = vand.u32 2147483647, %v2510_v39  ;;  %v1021_v60 = vand.u32 2147483647, %v949_v37 }
 0x21d   : > { %v1339_v62 = vpop.xlane.xlu2 %1338  ;;  %v1182_v47 = vsel %vm964_vm2, %v1081_v54, %v2269_v61 }
 0x21e   : > { %v1440_v1 = vsel %vm1222_vm3, %v1339_v62, %v1182_v47  ;;  %v1396_v2 = vsel %vm402_vm1, %v1279_v57, 0.0  ;;  %v1138_v3 = vsel %vm402_vm1, %v1021_v60, 0.0 }
 0x21f   : > { %1504 = vst [vmem:[%s2122_s26 + $0xc0] sm:$0xff] %v1440_v1  ;;  %v1397_v56 = vadd.f32 %v1396_v2, %v1278_v55  ;;  %v1139_v5 = vadd.f32 %v1138_v3, %v1020_v59 }
 0x221   : > { %v862_v6 = vpop.f32.mrf.mxu2  ;;  %v951_v10 = vpop.f32.mrf.mxu3  ;;  %1398 = vadd.xlane.f32.xlu2 %v1397_v56  ;;  %1140 = vadd.xlane.f32.xlu0 %v1139_v5 }
 0x222   : > { %v2527_v58 = vadd.f32 %v862_v6, %v2112_v8  ;;  %v952_v61 = vadd.f32 %v951_v10, %v2114_v9 }
 0x224   : > { %1537 = vst.msk [vmem:[%s2122_s26 + $0x1c8] sm:$0xff] %vm402_vm1, %v952_v61  ;;  %v1085_v11 = vpop.xlane.xlu1 %1084  ;;  %v1022_v12 = vand.u32 2147483647, %v2527_v58  ;;  %v1023_v13 = vand.u32 2147483647, %v952_v61  ;;  %v1280_v15 = vmul.f32 %v2527_v58, %v2527_v58  ;;  %v1281_v17 = vmul.f32 %v952_v61, %v952_v61 }
 0x225   : > { %v1184_v20 = vsel %vm964_vm2, %v1085_v11, %v2280_v14  ;;  %v1343_v21 = vpop.xlane.xlu0 %1342 }
 0x226   : > { %v1442_v23 = vsel %vm1222_vm3, %v1343_v21, %v1184_v20  ;;  %v1142_v24 = vsel %vm402_vm1, %v1023_v13, 0.0  ;;  %v1400_v25 = vsel %vm402_vm1, %v1281_v17, 0.0 }
 0x227   : > { %1506 = vst [vmem:[%s2122_s26 + $0xd0] sm:$0xff] %v1442_v23  ;;  %v1143_v27 = vadd.f32 %v1142_v24, %v1022_v12  ;;  %v1401_v28 = vadd.f32 %v1400_v25, %v1280_v15 }
 0x229   : > { %v864_v0 = vpop.f32.mrf.mxu2  ;;  %v953_v29 = vpop.f32.mrf.mxu3  ;;  %1144 = vadd.xlane.f32.xlu1 %v1143_v27  ;;  %1402 = vadd.xlane.f32.xlu0 %v1401_v28 }
 0x22a   : > { %v2544_v19 = vadd.f32 %v864_v0, %v2112_v8  ;;  %v954_v14 = vadd.f32 %v953_v29, %v2114_v9 }
 0x22c   : > { %1539 = vst.msk [vmem:[%s2122_s26 + $0x1d8] sm:$0xff] %vm402_vm1, %v954_v14  ;;  %v1347_v31 = vpop.xlane.xlu1 %1346  ;;  %v1089_v34 = vpop.xlane.xlu2 %1088  ;;  %v1024_v35 = vand.u32 2147483647, %v2544_v19  ;;  %v1025_v36 = vand.u32 2147483647, %v954_v14  ;;  %v1283_v21 = vmul.f32 %v954_v14, %v954_v14  ;;  %v1282_v23 = vmul.f32 %v2544_v19, %v2544_v19 }
 0x22d   : > { %v1186_v38 = vsel %vm964_vm2, %v1089_v34, %v2291_v33 }
 0x22e   : > { %v1444_v40 = vsel %vm1222_vm3, %v1347_v31, %v1186_v38  ;;  %v1146_v32 = vsel %vm402_vm1, %v1025_v36, 0.0  ;;  %v1404_v25 = vsel %vm402_vm1, %v1283_v21, 0.0 }
 0x22f   : > { %1508 = vst [vmem:[%s2122_s26 + $0xe0] sm:$0xff] %v1444_v40  ;;  %v1147_v41 = vadd.f32 %v1146_v32, %v1024_v35  ;;  %v1405_v0 = vadd.f32 %v1404_v25, %v1282_v23 }
 0x231   : > { %v867_v43 = vpop.f32.mrf.mxu2  ;;  %v956_v44 = vpop.f32.mrf.mxu3  ;;  %1148 = vadd.xlane.f32.xlu2 %v1147_v41 }
 0x232   : > { %v2558_v46 = vadd.f32 %v867_v43, %v2112_v8  ;;  %v957_v49 = vadd.f32 %v956_v44, %v2114_v9 }
 0x234   : > { %1541 = vst.msk [vmem:[%s2122_s26 + $0x1e8] sm:$0xff] %vm402_vm1, %v957_v49  ;;  %v1351_v50 = vpop.xlane.xlu2 %1350  ;;  %v1093_v33 = vpop.xlane.xlu0 %1092  ;;  %v1284_v52 = vmul.f32 %v2558_v46, %v2558_v46  ;;  %v1285_v37 = vmul.f32 %v957_v49, %v957_v49  ;;  %v1026_v54 = vand.u32 2147483647, %v2558_v46  ;;  %v1027_v55 = vand.u32 2147483647, %v957_v49 }
 0x235   : > { %v1188_v57 = vsel %vm964_vm2, %v1093_v33, %v2304_v51 }
 0x236   : > { %v1446_v59 = vsel %vm1222_vm3, %v1351_v50, %v1188_v57  ;;  %v1408_v60 = vsel %vm402_vm1, %v1285_v37, 0.0  ;;  %v1150_v62 = vsel %vm402_vm1, %v1027_v55, 0.0 }
 0x237   : > { %1510 = vst [vmem:[%s2122_s26 + $0xf0] sm:$0xff] %v1446_v59  ;;  %v1409_v47 = vadd.f32 %v1408_v60, %v1284_v52  ;;  %v1151_v1 = vadd.f32 %v1150_v62, %v1026_v54 }
 0x239   : > { %v869_v2 = vpop.f32.mrf.mxu2  ;;  %v958_v3 = vpop.f32.mrf.mxu3  ;;  %1410 = vadd.xlane.f32.xlu2 %v1409_v47  ;;  %1152 = vadd.xlane.f32.xlu0 %v1151_v1 }
 0x23a   : > { %v2575_v56 = vadd.f32 %v869_v2, %v2112_v8  ;;  %v959_v51 = vadd.f32 %v958_v3, %v2114_v9 }
 0x23c   : > { %1543 = vst.msk [vmem:[%s2122_s26 + $0x1f8] sm:$0xff] %vm402_vm1, %v959_v51  ;;  %v1097_v5 = vpop.xlane.xlu1 %1096  ;;  %v1355_v6 = vpop.xlane.xlu0 %1354  ;;  %v1028_v10 = vand.u32 2147483647, %v2575_v56  ;;  %v1029_v61 = vand.u32 2147483647, %v959_v51  ;;  %v1286_v11 = vmul.f32 %v2575_v56, %v2575_v56  ;;  %v1287_v12 = vmul.f32 %v959_v51, %v959_v51 }
 0x23d   : > { %v1190_v13 = vsel %vm964_vm2, %v1097_v5, %v2323_v7 }
 0x23e   : > { %v1448_v8 = vsel %vm1222_vm3, %v1355_v6, %v1190_v13  ;;  %v1154_v9 = vsel %vm402_vm1, %v1029_v61, 0.0  ;;  %v1412_v15 = vsel %vm402_vm1, %v1287_v12, 0.0 }
 0x23f   : > { %1512 = vst [vmem:[%s2122_s26 + $0x100] sm:$0xff] %v1448_v8  ;;  %v1155_v17 = vadd.f32 %v1154_v9, %v1028_v10  ;;  %v1413_v20 = vadd.f32 %v1412_v15, %v1286_v11 }
 0x241   : > { %1156 = vadd.xlane.f32.xlu1 %v1155_v17  ;;  %1414 = vadd.xlane.f32.xlu0 %v1413_v20 }
 0x244   : > { %v1359_v24 = vpop.xlane.xlu1 %1358  ;;  %v1101_v7 = vpop.xlane.xlu2 %1100 }
 0x245   : > { %v1192_v27 = vsel %vm964_vm2, %v1101_v7, %v2334_v26 }
 0x246   : > { %v1450_v28 = vsel %vm1222_vm3, %v1359_v24, %v1192_v27 }
 0x247   : > { %1514 = vst [vmem:[%s2122_s26 + $0x110] sm:$0xff] %v1450_v28 }
 0x249   : > { %1406 = vadd.xlane.f32.xlu1 %v1405_v0 }
 0x24c   : > { %v1363_v29 = vpop.xlane.xlu2 %1362  ;;  %v1105_v14 = vpop.xlane.xlu0 %1104 }
 0x24d   : > { %v1194_v31 = vsel %vm964_vm2, %v1105_v14, %v2351_v48 }
 0x24e   : > { %v1452_v34 = vsel %vm1222_vm3, %v1363_v29, %v1194_v31 }
 0x24f   : > { %1516 = vst [vmem:[%s2122_s26 + $0x120] sm:$0xff] %v1452_v34 }
 0x254   : > { %v1109_v35 = vpop.xlane.xlu1 %1108  ;;  %v1367_v26 = vpop.xlane.xlu0 %1366 }
 0x255   : > { %v1196_v36 = vsel %vm964_vm2, %v1109_v35, %v2368_v4 }
 0x256   : > { %v1454_v38 = vsel %vm1222_vm3, %v1367_v26, %v1196_v36 }
 0x257   : > { %1518 = vst [vmem:[%s2122_s26 + $0x130] sm:$0xff] %v1454_v38 }
 0x25c   : > { %v1371_v40 = vpop.xlane.xlu1 %1370  ;;  %v1113_v32 = vpop.xlane.xlu2 %1112 }
 0x25d   : > { %v1198_v48 = vsel %vm964_vm2, %v1113_v32, %v2391_v22 }
 0x25e   : > { %v1456_v41 = vsel %vm1222_vm3, %v1371_v40, %v1198_v48 }
 0x25f   : > { %1520 = vst [vmem:[%s2122_s26 + $0x140] sm:$0xff] %v1456_v41 }
 0x264   : > { %v1375_v43 = vpop.xlane.xlu2 %1374  ;;  %v1117_v44 = vpop.xlane.xlu0 %1116 }
 0x265   : > { %v1200_v4 = vsel %vm964_vm2, %v1117_v44, %v2408_v53 }
 0x266   : > { %v1458_v49 = vsel %vm1222_vm3, %v1375_v43, %v1200_v4 }
 0x267   : > { %1522 = vst [vmem:[%s2122_s26 + $0x150] sm:$0xff] %v1458_v49 }
 0x26c   : > { %v1121_v50 = vpop.xlane.xlu1 %1120  ;;  %v1379_v33 = vpop.xlane.xlu0 %1378 }
 0x26d   : > { %v1202_v22 = vsel %vm964_vm2, %v1121_v50, %v2425_v16 }
 0x26e   : > { %v1460_v52 = vsel %vm1222_vm3, %v1379_v33, %v1202_v22 }
 0x26f   : > { %1524 = vst [vmem:[%s2122_s26 + $0x160] sm:$0xff] %v1460_v52 }
 0x274   : > { %v1383_v37 = vpop.xlane.xlu1 %1382  ;;  %v1125_v54 = vpop.xlane.xlu2 %1124 }
 0x275   : > { %v1204_v53 = vsel %vm964_vm2, %v1125_v54, %v2442_v30 }
 0x276   : > { %v1462_v55 = vsel %vm1222_vm3, %v1383_v37, %v1204_v53 }
 0x277   : > { %1526 = vst [vmem:[%s2122_s26 + $0x170] sm:$0xff] %v1462_v55 }
 0x27c   : > { %v1387_v57 = vpop.xlane.xlu2 %1386  ;;  %v1129_v59 = vpop.xlane.xlu0 %1128 }
 0x27d   : > { %v1206_v16 = vsel %vm964_vm2, %v1129_v59, %v2459_v42 }
 0x27e   : > { %v1464_v60 = vsel %vm1222_vm3, %v1387_v57, %v1206_v16 }
 0x27f   : > { %1528 = vst [vmem:[%s2122_s26 + $0x180] sm:$0xff] %v1464_v60 }
 0x284   : > { %v1133_v62 = vpop.xlane.xlu1 %1132  ;;  %v1391_v47 = vpop.xlane.xlu0 %1390 }
 0x285   : > { %v1208_v30 = vsel %vm964_vm2, %v1133_v62, %v2476_v63 }
 0x286   : > { %v1466_v1 = vsel %vm1222_vm3, %v1391_v47, %v1208_v30 }
 0x287   : > { %1530 = vst [vmem:[%s2122_s26 + $0x190] sm:$0xff] %v1466_v1 }
 0x28c   : > { %v1395_v2 = vpop.xlane.xlu1 %1394  ;;  %v1137_v3 = vpop.xlane.xlu2 %1136 }
 0x28d   : > { %v1210_v42 = vsel %vm964_vm2, %v1137_v3, %v2493_v18 }
 0x28e   : > { %v1468_v51 = vsel %vm1222_vm3, %v1395_v2, %v1210_v42 }
 0x28f   : > { %1532 = vst [vmem:[%s2122_s26 + $0x1a0] sm:$0xff] %v1468_v51 }
 0x294   : > { %v1399_v5 = vpop.xlane.xlu2 %1398  ;;  %v1141_v6 = vpop.xlane.xlu0 %1140 }
 0x295   : > { %v1212_v63 = vsel %vm964_vm2, %v1141_v6, %v2510_v39 }
 0x296   : > { %v1470_v10 = vsel %vm1222_vm3, %v1399_v5, %v1212_v63 }
 0x297   : > { %1534 = vst [vmem:[%s2122_s26 + $0x1b0] sm:$0xff] %v1470_v10 }
 0x29c   : > { %v1145_v61 = vpop.xlane.xlu1 %1144  ;;  %v1403_v11 = vpop.xlane.xlu0 %1402 }
 0x29d   : > { %v1214_v18 = vsel %vm964_vm2, %v1145_v61, %v2527_v58 }
 0x29e   : > { %v1472_v12 = vsel %vm1222_vm3, %v1403_v11, %v1214_v18 }
 0x29f   : > { %1536 = vst [vmem:[%s2122_s26 + $0x1c0] sm:$0xff] %v1472_v12 }
 0x2a4   : > { %v1149_v13 = vpop.xlane.xlu2 %1148 }
 0x2a5   : > { %v1216_v23 = vsel %vm964_vm2, %v1149_v13, %v2544_v19 }
 0x2ac   : > { %v1411_v8 = vpop.xlane.xlu2 %1410  ;;  %v1153_v9 = vpop.xlane.xlu0 %1152 }
 0x2ad   : > { %v1218_v39 = vsel %vm964_vm2, %v1153_v9, %v2558_v46 }
 0x2ae   : > { %v1476_v15 = vsel %vm1222_vm3, %v1411_v8, %v1218_v39 }
 0x2af   : > { %1540 = vst [vmem:[%s2122_s26 + $0x1e0] sm:$0xff] %v1476_v15 }
 0x2b4   : > { %v1157_v17 = vpop.xlane.xlu1 %1156  ;;  %v1415_v20 = vpop.xlane.xlu0 %1414 }
 0x2b5   : > { %v1220_v58 = vsel %vm964_vm2, %v1157_v17, %v2575_v56 }
 0x2b6   : > { %v1478_v21 = vsel %vm1222_vm3, %v1415_v20, %v1220_v58 }
 0x2b7   : > { %1542 = vst [vmem:[%s2122_s26 + $0x1f0] sm:$0xff] %v1478_v21 }
 0x2bc   : > { %v1407_v24 = vpop.xlane.xlu1 %1406 }
 0x2bd   : > { %v1474_v46 = vsel %vm1222_vm3, %v1407_v24, %v1216_v23 }
 0x2be   : > { %1538 = vst [vmem:[%s2122_s26 + $0x1d0] sm:$0xff] %v1474_v46 }
 0x2bf PF: > { %s15_s18 = sadd.s32 1, %s1832_s18  }
 0x2c0   : > { %p12_p4 = scmp.ge.s32.totalorder %s15_s18, 4  }
 0x2c2   :  { %14 = sbr.rel (!%p12_p4) target bundleno = 1 (0x1), region = 70 }

</bundles_post_ra>
